<compile_context>
chip_gen: v5e
topology: v5e:2x2
jax: 0.10.0
libtpu: 0.0.40
codegen_flags: <defaults>
</compile_context>

<pallas_src>
import jax
import jax.numpy as jnp
from jax.experimental import pallas as pl
from jax.experimental.pallas import tpu as pltpu


def _round_up(x, m):
    return ((x + m - 1) // m) * m


def _vmem_budget_bytes():
    """Per-generation VMEM budget (v5e/v6e: 128 MiB physical, v7x: 64 MiB)."""
    try:
        cap = int(pltpu.get_tpu_info().vmem_capacity_bytes)
    except Exception:  # non-TPU trace / older jax: be conservative (v7x-safe)
        cap = 64 * 1024 * 1024
    # Leave headroom for Mosaic internals and double-buffering slack.
    return min((cap * 3) // 4, 96 * 1024 * 1024)


# --------------------------------------------------------------------------- kernels
def _patch_embed_single_kernel(x_ref, w_ref, b_ref, o_ref):
    """Whole-K projection in one grid step.

    bf16 cast happens in-kernel (unused VALU slots), MXU accumulates in f32,
    bias add is fused, and the store is a single unmasked lane-dense write.
    """
    acc = jnp.dot(
        x_ref[...].astype(jnp.bfloat16),
        w_ref[...].astype(jnp.bfloat16),
        preferred_element_type=jnp.float32,
    )
    o_ref[...] = (acc + b_ref[...]).astype(o_ref.dtype)


def _patch_embed_ktiled_kernel(x_ref, w_ref, b_ref, o_ref):
    """General path when full-K tiles would not fit VMEM.

    The output block's index map ignores k, so o_ref stays resident in VMEM
    across the reduction: accumulate directly into it (no scratch, no epilogue
    copy).  The bias is folded into the k == 0 step.
    """
    k = pl.program_id(2)
    partial = jnp.dot(
        x_ref[...].astype(jnp.bfloat16),
        w_ref[...].astype(jnp.bfloat16),
        preferred_element_type=jnp.float32,
    )

    @pl.when(k == 0)
    def _():
        o_ref[...] = (partial + b_ref[...]).astype(o_ref.dtype)

    @pl.when(k != 0)
    def _():
        o_ref[...] = o_ref[...] + partial.astype(o_ref.dtype)


# -------------------------------------------------------------------------- wrapper
def _projection(x2, w, b, *, tm=256, tn=512):
    """y = x2 @ w + b.  f32 in, f32 out; bf16 MXU operands; f32 accumulation."""
    M, K = x2.shape
    Kw, N = w.shape
    assert K == Kw, (K, Kw)

    budget = _vmem_budget_bytes()

    # ----- tile sizes (respect the (8, 128) layout; prefer no pad / no K loop) -----
    Mp = _round_up(M, 8)
    TM = Mp if Mp <= _round_up(tm, 8) else 256
    Mp = _round_up(Mp, TM)

    Np = _round_up(N, 128)
    if Np <= _round_up(tn, 128):
        TN = Np
    else:
        TN = 128
        for cand in range(_round_up(tn, 128), 0, -128):
            if Np % cand == 0:
                TN = cand
                break

    Kp = _round_up(K, 128)

    def footprint(tk):
        # double-buffered f32 input tiles + resident f32 output block (bytes)
        return (2 * (TM * tk + tk * TN + TN) + TM * TN) * 4

    TK = Kp
    while footprint(TK) > budget and TK > 512:
        TK = max(512, _round_up(TK // 2, 128))
    Kp = _round_up(K, TK)

    # ----- pad only when the true shapes are not already tile-aligned -----
    if (Mp, Kp) != (M, K):
        x2 = jnp.pad(x2, ((0, Mp - M), (0, Kp - K)))
    if (Kp, Np) != (K, N):
        w = jnp.pad(w, ((0, Kp - K), (0, Np - N)))
    b2 = b.astype(jnp.float32).reshape(1, N)
    if Np != N:
        b2 = jnp.pad(b2, ((0, 0), (0, Np - N)))

    cost = pl.CostEstimate(
        flops=2 * M * K * N,
        transcendentals=0,
        bytes_accessed=(M * K + K * N + N + M * N) * 4,
    )

    if TK == Kp:
        # Single reduction step: 2-D grid, no scratch, no pl.when.
        out = pl.pallas_call(
            _patch_embed_single_kernel,
            out_shape=jax.ShapeDtypeStruct((Mp, Np), jnp.float32),
            grid_spec=pltpu.PrefetchScalarGridSpec(
                num_scalar_prefetch=0,
                grid=(Mp // TM, Np // TN),
                in_specs=[
                    pl.BlockSpec((TM, Kp), lambda i, j: (i, 0)),
                    pl.BlockSpec((Kp, TN), lambda i, j: (0, j)),
                    pl.BlockSpec((1, TN), lambda i, j: (0, j)),
                ],
                out_specs=pl.BlockSpec((TM, TN), lambda i, j: (i, j)),
            ),
            compiler_params=pltpu.CompilerParams(
                dimension_semantics=("parallel", "parallel"),
                vmem_limit_bytes=budget,
            ),
            cost_estimate=cost,
        )(x2, w, b2)
    else:
        # K-tiled fallback for very large num_patches / embedding_dim.
        out = pl.pallas_call(
            _patch_embed_ktiled_kernel,
            out_shape=jax.ShapeDtypeStruct((Mp, Np), jnp.float32),
            grid_spec=pltpu.PrefetchScalarGridSpec(
                num_scalar_prefetch=0,
                grid=(Mp // TM, Np // TN, Kp // TK),
                in_specs=[
                    pl.BlockSpec((TM, TK), lambda i, j, k: (i, k)),
                    pl.BlockSpec((TK, TN), lambda i, j, k: (k, j)),
                    pl.BlockSpec((1, TN), lambda i, j, k: (0, j)),
                ],
                out_specs=pl.BlockSpec((TM, TN), lambda i, j, k: (i, j)),
            ),
            compiler_params=pltpu.CompilerParams(
                dimension_semantics=("parallel", "parallel", "arbitrary"),
                vmem_limit_bytes=budget,
            ),
            cost_estimate=cost,
        )(x2, w, b2)

    if (Mp, Np) != (M, N):
        out = out[:M, :N]
    return out


def patch_embedding(x, w, b):
    """PatchEmbedding.forward.

    x: (B, C, *spatial)  -- e.g. a (B, C, D, H, W) volume
    w: (num_patches, embedding_dim)   (i.e. nn.Linear weight already transposed)
    b: (embedding_dim,)
    returns (B, C, embedding_dim) float32.
    """
    B, C = x.shape[0], x.shape[1]
    num_patches = 1
    for s in x.shape[2:]:
        num_patches *= s
    x2 = x.reshape(B * C, num_patches)      # torch.flatten(x, start_dim=2)
    y = _projection(x2, w, b)               # self.projection(x)
    return y.reshape(B, C, -1)


# ----------------------------------------------------------------------------- main
if __name__ == "__main__":
    key = jax.random.PRNGKey(0)

    B, C = 2, 4
    spatial = (16, 16, 16)
    num_patches = spatial[0] * spatial[1] * spatial[2]   # 4096
    embedding_dim = 128                                   # lane-dense output

    kx, kw, kb = jax.random.split(key, 3)
    x = jax.random.normal(kx, (B, C) + spatial, jnp.float32)
    bound = 1.0 / (num_patches ** 0.5)                    # nn.Linear default init range
    w = jax.random.uniform(kw, (num_patches, embedding_dim), jnp.float32, -bound, bound)
    b = jax.random.uniform(kb, (embedding_dim,), jnp.float32, -bound, bound)

    fwd = jax.jit(patch_embedding)
    y = jax.block_until_ready(fwd(x, w, b))

    assert y.shape == (B, C, embedding_dim), y.shape
    assert bool(jnp.all(jnp.isfinite(y)))

    # pure-JAX f32 reference; tolerance sized for bf16 MXU operands + f32 accumulation.
    ref = x.reshape(B, C, num_patches) @ w + b
    max_err = float(jnp.max(jnp.abs(y - ref)))
    assert max_err < 5e-2, max_err

    print("KERNEL_OK")
</pallas_src>

<mosaic_0001>
module attributes {stable_mosaic.version = 11 : i64} {
  func.func @_patch_embed_single_kernel(%arg0: i32, %arg1: i32, %arg2: memref<8x4096xf32, #tpu.memory_space<vmem>>, %arg3: memref<4096x128xf32, #tpu.memory_space<vmem>>, %arg4: memref<1x128xf32, #tpu.memory_space<vmem>>, %arg5: memref<8x128xf32, #tpu.memory_space<vmem>>) attributes {dimension_semantics = [#tpu.dimension_semantics<parallel>, #tpu.dimension_semantics<parallel>], iteration_bounds = array<i64: 1, 1>, scalar_prefetch = 0 : i64, scratch_operands = 0 : i64, tpu.core_type = #tpu.core_type<tc>, window_params = [{transform_indices = @transform_0, window_bounds = array<i64: 8, 4096>}, {transform_indices = @transform_1, window_bounds = array<i64: 4096, 128>}, {transform_indices = @transform_2, window_bounds = array<i64: 1, 128>}, {transform_indices = @transform_3, window_bounds = array<i64: 8, 128>}]} {
    %c0 = arith.constant 0 : index
    %c0_0 = arith.constant 0 : index
    %0 = vector.load %arg2[%c0, %c0_0] : memref<8x4096xf32, #tpu.memory_space<vmem>>, vector<8x4096xf32>
    %1 = arith.truncf %0 : vector<8x4096xf32> to vector<8x4096xbf16>
    %c0_1 = arith.constant 0 : index
    %c0_2 = arith.constant 0 : index
    %2 = vector.load %arg3[%c0_1, %c0_2] : memref<4096x128xf32, #tpu.memory_space<vmem>>, vector<4096x128xf32>
    %3 = arith.truncf %2 : vector<4096x128xf32> to vector<4096x128xbf16>
    %cst = arith.constant dense<0.000000e+00> : vector<8x128xf32>
    %4 = tpu.matmul %1, %3, %cst {dimension_numbers = #tpu.dot_dimension_numbers<[1], [0], [0], [1], [0, 0, 1, 1], [], []>} : vector<8x4096xbf16>, vector<4096x128xbf16>, vector<8x128xf32> -> vector<8x128xf32>
    %c0_3 = arith.constant 0 : index
    %c0_4 = arith.constant 0 : index
    %5 = vector.load %arg4[%c0_3, %c0_4] : memref<1x128xf32, #tpu.memory_space<vmem>>, vector<1x128xf32>
    %6 = vector.broadcast %5 : vector<1x128xf32> to vector<8x128xf32>
    %7 = arith.addf %4, %6 : vector<8x128xf32>
    %c0_5 = arith.constant 0 : index
    %c0_6 = arith.constant 0 : index
    %8 = vector.load %arg5[%c0_5, %c0_6] : memref<8x128xf32, #tpu.memory_space<vmem>>, vector<8x128xf32>
    tpu.vector_store %arg5[%c0_5, %c0_6], %7 {strides = array<i32>} : memref<8x128xf32, #tpu.memory_space<vmem>>, vector<8x128xf32>,
    return
  }
  func.func @transform_0(%arg0: i32, %arg1: i32) -> (i32, i32) {
    %c0_i32 = arith.constant 0 : i32
    %c0_i32_0 = arith.constant 0 : i32
    return %arg0, %c0_i32 : i32, i32
  }
  func.func @transform_1(%arg0: i32, %arg1: i32) -> (i32, i32) {
    %c0_i32 = arith.constant 0 : i32
    %c0_i32_0 = arith.constant 0 : i32
    return %c0_i32, %arg1 : i32, i32
  }
  func.func @transform_2(%arg0: i32, %arg1: i32) -> (i32, i32) {
    %c0_i32 = arith.constant 0 : i32
    %c0_i32_0 = arith.constant 0 : i32
    return %c0_i32, %arg1 : i32, i32
  }
  func.func @transform_3(%arg0: i32, %arg1: i32) -> (i32, i32) {
    %c0_i32 = arith.constant 0 : i32
    return %arg0, %arg1 : i32, i32
  }
}

</mosaic_0001>

<bundles_post_ra>
// kernel: patch_embedding.1
= control target key start
LH: loop header
LB: loop body
LE: loop exit
PB: predicated region body
PF: predicated region fallthrough
CT: control target
= control target key end

     0   :  { %8 = vsyncpa [#allocation3], 0  ;;  %s1536_s0 = inlined_call_operand.vmem [shape: f32[8,4096], index: 0, kind: input, shape index: {}]   ;;  %s1537_s1 = inlined_call_operand.hbm [shape: f32[4096,128], index: 1, kind: input, shape index: {}]   ;;  %s1538_s2 = inlined_call_operand.hbm [shape: f32[1,128], index: 2, kind: input, shape index: {}]   ;;  %s1539_s3 = inlined_call_operand.hbm [shape: f32[8,128], index: 3, kind: output, shape index: {}]  }
   0x1   :  { %9 = vsyncpa [#allocation6], 0 }
   0x2   :  { %10 = vsyncpa [#allocation4], 0  ;;  %s17_s14 = sshll.u32 %s1537_s1, 4  ;;  %s1400_s15 = smov [#allocation2]   ;;  %s18_s14 = int_to_ptr.hbm [resolvable:$true] %s17_s14 }
   0x3   :  { %s19_s16 = sshll.u32 %s1400_s15, 4  ;;  %s31_s19 = sshll.u32 %s1538_s2, 4  ;;  %s20_s16 = int_to_ptr.vmem [resolvable:$true] %s19_s16  ;;  %s32_s19 = int_to_ptr.hbm [resolvable:$true] %s31_s19 }
   0x4   :  { %s1401_s20 = smov 128   ;;  %s1402_s21 = smov 8  }
   0x5   :  { %25 = dma.hbm_to_vmem [thread:$0]  %s18_s14, 65536, %s20_s16, [#allocation3], %s1401_s20, %s1401_s20, %s1402_s21  }
   0x6   :  { %s1403_s22 = smov [#allocation5]  }
   0x7   :  { %s33_s23 = sshll.u32 %s1403_s22, 4  ;;  %s34_s23 = int_to_ptr.vmem [resolvable:$true] %s33_s23 }
   0x8   :  { %36 = dma.hbm_to_vmem [thread:$0]  %s32_s19, 16, %s34_s23, [#allocation6]  }
   0x9   :  { %1394 = dma.done.wait [#allocation3], 65536  }
   0xa   :  { %1395 = vsyncadd [#allocation3], 4294901760 }
   0xb   :  { %1396 = dma.done.wait [#allocation6], 16  }
   0xc   :  { %1397 = vsyncadd [#allocation6], 4294967280  ;;  %v123_v0 = vld [vmem:[#allocation2 + $0x70] sm:$0xff]  ;;  %v124_v1 = vld [vmem:[#allocation2 + $0x78] sm:$0xff]  ;;  %s1305_s4 = sshll.u32 %s1539_s3, 4  ;;  %s1306_s4 = int_to_ptr.hbm [resolvable:$true] %s1305_s4 }
   0xd   :  { %v139_v2 = vld [vmem:[#allocation2 + $0xf0] sm:$0xff]  ;;  %v628_v3 = vpack.c.bf16 %v124_v1, %v123_v0  ;;  %v140_v4 = vld [vmem:[#allocation2 + $0xf8] sm:$0xff]  ;;  %v121_v11 = vld [vmem:[#allocation2 + $0x60] sm:$0xff] }
   0xe   :  { %v155_v5 = vld [vmem:[#allocation2 + $0x170] sm:$0xff]  ;;  %v156_v6 = vld [vmem:[#allocation2 + $0x178] sm:$0xff]  ;;  %v636_v7 = vpack.c.bf16 %v140_v4, %v139_v2  ;;  %v122_v13 = vld [vmem:[#allocation2 + $0x68] sm:$0xff] }
   0xf   :  { %v644_v8 = vpack.c.bf16 %v156_v6, %v155_v5  ;;  %v171_v9 = vld [vmem:[#allocation2 + $0x1f0] sm:$0xff]  ;;  %v172_v10 = vld [vmem:[#allocation2 + $0x1f8] sm:$0xff]  ;;  %881 = vmatpush.bf16.msra.mxu0 %v628_v3  ;;  %v137_v14 = vld [vmem:[#allocation2 + $0xe0] sm:$0xff]  ;;  %v627_v16 = vpack.c.bf16 %v122_v13, %v121_v11 }
  0x10   :  { %v652_v12 = vpack.c.bf16 %v172_v10, %v171_v9  ;;  %v138_v15 = vld [vmem:[#allocation2 + $0xe8] sm:$0xff]  ;;  %894 = vmatpush.bf16.msra.mxu1 %v636_v7  ;;  %v153_v18 = vld [vmem:[#allocation2 + $0x160] sm:$0xff]  ;;  %v119_v23 = vld [vmem:[#allocation2 + $0x50] sm:$0xff] }
  0x11   :  { %907 = vmatpush.bf16.msra.mxu2 %v644_v8  ;;  %v635_v17 = vpack.c.bf16 %v138_v15, %v137_v14  ;;  %v154_v19 = vld [vmem:[#allocation2 + $0x168] sm:$0xff]  ;;  %v169_v20 = vld [vmem:[#allocation2 + $0x1e0] sm:$0xff]  ;;  %v120_v24 = vld [vmem:[#allocation2 + $0x58] sm:$0xff] }
  0x12   :  { %920 = vmatpush.bf16.msra.mxu3 %v652_v12  ;;  %v643_v21 = vpack.c.bf16 %v154_v19, %v153_v18  ;;  %v170_v22 = vld [vmem:[#allocation2 + $0x1e8] sm:$0xff]  ;;  %v135_v26 = vld [vmem:[#allocation2 + $0xd0] sm:$0xff]  ;;  %v136_v27 = vld [vmem:[#allocation2 + $0xd8] sm:$0xff]  ;;  %v626_v29 = vpack.c.bf16 %v120_v24, %v119_v23 }
  0x13   :  { %v651_v25 = vpack.c.bf16 %v170_v22, %v169_v20  ;;  %v151_v28 = vld [vmem:[#allocation2 + $0x150] sm:$0xff]  ;;  %882 = vmatpush.bf16.msra.mxu0 %v627_v16  ;;  %v152_v30 = vld [vmem:[#allocation2 + $0x158] sm:$0xff]  ;;  %v634_v33 = vpack.c.bf16 %v136_v27, %v135_v26  ;;  %v117_v35 = vld [vmem:[#allocation2 + $0x40] sm:$0xff] }
  0x14   :  { %v167_v31 = vld [vmem:[#allocation2 + $0x1d0] sm:$0xff]  ;;  %v168_v32 = vld [vmem:[#allocation2 + $0x1d8] sm:$0xff]  ;;  %895 = vmatpush.bf16.msra.mxu1 %v635_v17  ;;  %v642_v34 = vpack.c.bf16 %v152_v30, %v151_v28  ;;  %v118_v36 = vld [vmem:[#allocation2 + $0x48] sm:$0xff] }
  0x15   :  { %908 = vmatpush.bf16.msra.mxu2 %v643_v21  ;;  %v133_v37 = vld [vmem:[#allocation2 + $0xc0] sm:$0xff]  ;;  %v650_v38 = vpack.c.bf16 %v168_v32, %v167_v31  ;;  %v134_v39 = vld [vmem:[#allocation2 + $0xc8] sm:$0xff]  ;;  %v625_v44 = vpack.c.bf16 %v118_v36, %v117_v35  ;;  %v115_v47 = vld [vmem:[#allocation2 + $0x30] sm:$0xff] }
  0x16   :  { %921 = vmatpush.bf16.msra.mxu3 %v651_v25  ;;  %v149_v40 = vld [vmem:[#allocation2 + $0x140] sm:$0xff]  ;;  %v150_v41 = vld [vmem:[#allocation2 + $0x148] sm:$0xff]  ;;  %v633_v45 = vpack.c.bf16 %v134_v39, %v133_v37  ;;  %v116_v48 = vld [vmem:[#allocation2 + $0x38] sm:$0xff] }
  0x17   :  { %v165_v42 = vld [vmem:[#allocation2 + $0x1c0] sm:$0xff]  ;;  %v166_v43 = vld [vmem:[#allocation2 + $0x1c8] sm:$0xff]  ;;  %883 = vmatpush.bf16.msra.mxu0 %v626_v29  ;;  %v641_v46 = vpack.c.bf16 %v150_v41, %v149_v40  ;;  %v131_v49 = vld [vmem:[#allocation2 + $0xb0] sm:$0xff]  ;;  %v624_v56 = vpack.c.bf16 %v116_v48, %v115_v47 }
  0x18   :  { %896 = vmatpush.bf16.msra.mxu1 %v634_v33  ;;  %v649_v50 = vpack.c.bf16 %v166_v43, %v165_v42  ;;  %v132_v51 = vld [vmem:[#allocation2 + $0xb8] sm:$0xff]  ;;  %v147_v52 = vld [vmem:[#allocation2 + $0x130] sm:$0xff]  ;;  %v113_v59 = vld [vmem:[#allocation2 + $0x20] sm:$0xff] }
  0x19   :  { %909 = vmatpush.bf16.msra.mxu2 %v642_v34  ;;  %v148_v53 = vld [vmem:[#allocation2 + $0x138] sm:$0xff]  ;;  %v163_v54 = vld [vmem:[#allocation2 + $0x1b0] sm:$0xff]  ;;  %v632_v57 = vpack.c.bf16 %v132_v51, %v131_v49  ;;  %v114_v60 = vld [vmem:[#allocation2 + $0x28] sm:$0xff] }
  0x1a   :  { %922 = vmatpush.bf16.msra.mxu3 %v650_v38  ;;  %v164_v55 = vld [vmem:[#allocation2 + $0x1b8] sm:$0xff]  ;;  %v640_v58 = vpack.c.bf16 %v148_v53, %v147_v52  ;;  %v129_v61 = vld [vmem:[#allocation2 + $0xa0] sm:$0xff]  ;;  %v130_v63 = vld [vmem:[#allocation2 + $0xa8] sm:$0xff]  ;;  %v623_v4 = vpack.c.bf16 %v114_v60, %v113_v59 }
  0x1b   :  { %884 = vmatpush.bf16.msra.mxu0 %v625_v44  ;;  %v648_v62 = vpack.c.bf16 %v164_v55, %v163_v54  ;;  %v145_v0 = vld [vmem:[#allocation2 + $0x120] sm:$0xff]  ;;  %v146_v1 = vld [vmem:[#allocation2 + $0x128] sm:$0xff]  ;;  %v631_v5 = vpack.c.bf16 %v130_v63, %v129_v61  ;;  %v111_v7 = vld [vmem:[#allocation2 + $0x10] sm:$0xff] }
  0x1c   :  { %897 = vmatpush.bf16.msra.mxu1 %v633_v45  ;;  %v161_v2 = vld [vmem:[#allocation2 + $0x1a0] sm:$0xff]  ;;  %v162_v3 = vld [vmem:[#allocation2 + $0x1a8] sm:$0xff]  ;;  %v639_v6 = vpack.c.bf16 %v146_v1, %v145_v0  ;;  %v112_v8 = vld [vmem:[#allocation2 + $0x18] sm:$0xff] }
  0x1d   :  { %910 = vmatpush.bf16.msra.mxu2 %v641_v46  ;;  %v127_v9 = vld [vmem:[#allocation2 + $0x90] sm:$0xff]  ;;  %v647_v10 = vpack.c.bf16 %v162_v3, %v161_v2  ;;  %v128_v11 = vld [vmem:[#allocation2 + $0x98] sm:$0xff]  ;;  %v622_v16 = vpack.c.bf16 %v112_v8, %v111_v7  ;;  %v109_v17 = vld [vmem:[#allocation2] sm:$0xff] }
  0x1e   :  { %923 = vmatpush.bf16.msra.mxu3 %v649_v50  ;;  %v143_v12 = vld [vmem:[#allocation2 + $0x110] sm:$0xff]  ;;  %v144_v13 = vld [vmem:[#allocation2 + $0x118] sm:$0xff]  ;;  %v110_v18 = vld [vmem:[#allocation2 + $0x8] sm:$0xff]  ;;  %v630_v19 = vpack.c.bf16 %v128_v11, %v127_v9 }
  0x1f   :  { %885 = vmatpush.bf16.msra.mxu0 %v624_v56  ;;  %v159_v14 = vld [vmem:[#allocation2 + $0x190] sm:$0xff]  ;;  %v160_v15 = vld [vmem:[#allocation2 + $0x198] sm:$0xff]  ;;  %v638_v20 = vpack.c.bf16 %v144_v13, %v143_v12  ;;  %v125_v21 = vld [vmem:[#allocation2 + $0x80] sm:$0xff]  ;;  %v621_v31 = vpack.c.bf16 %v110_v18, %v109_v17 }
  0x20   :  { %898 = vmatpush.bf16.msra.mxu1 %v632_v57  ;;  %v126_v22 = vld [vmem:[#allocation2 + $0x88] sm:$0xff]  ;;  %v141_v23 = vld [vmem:[#allocation2 + $0x100] sm:$0xff]  ;;  %v646_v24 = vpack.c.bf16 %v160_v15, %v159_v14  ;;  %v187_v28 = vld [vmem:[#allocation2 + $0x270] sm:$0xff] }
  0x21   :  { %911 = vmatpush.bf16.msra.mxu2 %v640_v58  ;;  %v142_v25 = vld [vmem:[#allocation2 + $0x108] sm:$0xff]  ;;  %v157_v26 = vld [vmem:[#allocation2 + $0x180] sm:$0xff]  ;;  %v188_v29 = vld [vmem:[#allocation2 + $0x278] sm:$0xff]  ;;  %v629_v35 = vpack.c.bf16 %v126_v22, %v125_v21 }
  0x22   :  { %924 = vmatpush.bf16.msra.mxu3 %v648_v62  ;;  %v158_v27 = vld [vmem:[#allocation2 + $0x188] sm:$0xff]  ;;  %v203_v30 = vld [vmem:[#allocation2 + $0x2f0] sm:$0xff]  ;;  %v204_v32 = vld [vmem:[#allocation2 + $0x2f8] sm:$0xff]  ;;  %v637_v36 = vpack.c.bf16 %v142_v25, %v141_v23  ;;  %v660_v40 = vpack.c.bf16 %v188_v29, %v187_v28 }
  0x23   :  { %886 = vmatpush.bf16.msra.mxu0 %v623_v4  ;;  %v219_v33 = vld [vmem:[#allocation2 + $0x370] sm:$0xff]  ;;  %v220_v34 = vld [vmem:[#allocation2 + $0x378] sm:$0xff]  ;;  %v645_v39 = vpack.c.bf16 %v158_v27, %v157_v26  ;;  %v668_v41 = vpack.c.bf16 %v204_v32, %v203_v30  ;;  %v185_v43 = vld [vmem:[#allocation2 + $0x260] sm:$0xff] }
  0x24   :  { %899 = vmatpush.bf16.msra.mxu1 %v631_v5  ;;  %v235_v37 = vld [vmem:[#allocation2 + $0x3f0] sm:$0xff]  ;;  %v236_v38 = vld [vmem:[#allocation2 + $0x3f8] sm:$0xff]  ;;  %v676_v42 = vpack.c.bf16 %v220_v34, %v219_v33  ;;  %v186_v44 = vld [vmem:[#allocation2 + $0x268] sm:$0xff] }
  0x25   :  { %912 = vmatpush.bf16.msra.mxu2 %v639_v6  ;;  %v201_v45 = vld [vmem:[#allocation2 + $0x2e0] sm:$0xff]  ;;  %v684_v46 = vpack.c.bf16 %v236_v38, %v235_v37  ;;  %v202_v47 = vld [vmem:[#allocation2 + $0x2e8] sm:$0xff]  ;;  %v659_v52 = vpack.c.bf16 %v186_v44, %v185_v43  ;;  %v183_v53 = vld [vmem:[#allocation2 + $0x250] sm:$0xff] }
  0x26   :  { %925 = vmatpush.bf16.msra.mxu3 %v647_v10  ;;  %v217_v48 = vld [vmem:[#allocation2 + $0x360] sm:$0xff]  ;;  %v218_v49 = vld [vmem:[#allocation2 + $0x368] sm:$0xff]  ;;  %v667_v54 = vpack.c.bf16 %v202_v47, %v201_v45  ;;  %v184_v56 = vld [vmem:[#allocation2 + $0x258] sm:$0xff] }
  0x27   :  { %887 = vmatpush.bf16.msra.mxu0 %v622_v16  ;;  %v233_v50 = vld [vmem:[#allocation2 + $0x3e0] sm:$0xff]  ;;  %v234_v51 = vld [vmem:[#allocation2 + $0x3e8] sm:$0xff]  ;;  %v675_v55 = vpack.c.bf16 %v218_v49, %v217_v48  ;;  %v199_v57 = vld [vmem:[#allocation2 + $0x2d0] sm:$0xff]  ;;  %v658_v2 = vpack.c.bf16 %v184_v56, %v183_v53 }
  0x28   :  { %900 = vmatpush.bf16.msra.mxu1 %v630_v19  ;;  %v47_v58 = vld [vmem:[%s1536_s0 + $0x10] sm:$0xff]  ;;  %v683_v59 = vpack.c.bf16 %v234_v51, %v233_v50  ;;  %v200_v60 = vld [vmem:[#allocation2 + $0x2d8] sm:$0xff]  ;;  %v181_v3 = vld [vmem:[#allocation2 + $0x240] sm:$0xff] }
  0x29   :  { %913 = vmatpush.bf16.msra.mxu2 %v638_v20  ;;  %v215_v61 = vld [vmem:[#allocation2 + $0x350] sm:$0xff]  ;;  %v216_v62 = vld [vmem:[#allocation2 + $0x358] sm:$0xff]  ;;  %v79_v63 = vpack.c.bf16 %v47_v58, %v47_v58  ;;  %v182_v4 = vld [vmem:[#allocation2 + $0x248] sm:$0xff]  ;;  %v666_v6 = vpack.c.bf16 %v200_v60, %v199_v57 }
  0x2a   :  { %926 = vmatpush.bf16.msra.mxu3 %v646_v24  ;;  %v231_v0 = vld [vmem:[#allocation2 + $0x3d0] sm:$0xff]  ;;  %v232_v1 = vld [vmem:[#allocation2 + $0x3d8] sm:$0xff]  ;;  %v45_v5 = vld [vmem:[%s1536_s0] sm:$0xff]  ;;  %v674_v7 = vpack.c.bf16 %v216_v62, %v215_v61  ;;  %v657_v20 = vpack.c.bf16 %v182_v4, %v181_v3 }
  0x2b   :  { %888 = vmatpush.bf16.msra.mxu0 %v621_v31  ;;  %v197_v8 = vld [vmem:[#allocation2 + $0x2c0] sm:$0xff]  ;;  %v77_v9 = vpack.c.bf16 %v45_v5, %v45_v5  ;;  %v48_v10 = vld [vmem:[%s1536_s0 + $0x18] sm:$0xff]  ;;  %v46_v11 = vld [vmem:[%s1536_s0 + $0x8] sm:$0xff]  ;;  %v682_v12 = vpack.c.bf16 %v232_v1, %v231_v0 }
  0x2c   :  { %901 = vmatpush.bf16.msra.mxu1 %v629_v35  ;;  %v198_v13 = vld [vmem:[#allocation2 + $0x2c8] sm:$0xff]  ;;  %v213_v14 = vld [vmem:[#allocation2 + $0x340] sm:$0xff]  ;;  %v80_v16 = vpack.c.bf16 %v48_v10, %v48_v10  ;;  %v78_v17 = vpack.c.bf16 %v46_v11, %v46_v11  ;;  %v179_v23 = vld [vmem:[#allocation2 + $0x230] sm:$0xff] }
  0x2d   :  { %914 = vmatpush.bf16.msra.mxu2 %v637_v36  ;;  %v214_v15 = vld [vmem:[#allocation2 + $0x348] sm:$0xff]  ;;  %v229_v18 = vld [vmem:[#allocation2 + $0x3c0] sm:$0xff]  ;;  %v665_v21 = vpack.c.bf16 %v198_v13, %v197_v8  ;;  %v180_v24 = vld [vmem:[#allocation2 + $0x238] sm:$0xff] }
  0x2e   :  { %927 = vmatpush.bf16.msra.mxu3 %v645_v39  ;;  %v230_v19 = vld [vmem:[#allocation2 + $0x3c8] sm:$0xff]  ;;  %889 = vmatmul.bf16.vlgmr.msra.gmra.mxu0 %v77_v9  ;;  %v673_v22 = vpack.c.bf16 %v214_v15, %v213_v14  ;;  %v195_v25 = vld [vmem:[#allocation2 + $0x2b0] sm:$0xff]  ;;  %v196_v27 = vld [vmem:[#allocation2 + $0x2b8] sm:$0xff]  ;;  %v656_v32 = vpack.c.bf16 %v180_v24, %v179_v23 }
  0x2f   :  { %933 = vmatpush.bf16.msrb.mxu0 %v660_v40  ;;  %v681_v26 = vpack.c.bf16 %v230_v19, %v229_v18  ;;  %v211_v28 = vld [vmem:[#allocation2 + $0x330] sm:$0xff]  ;;  %v212_v29 = vld [vmem:[#allocation2 + $0x338] sm:$0xff]  ;;  %902 = vmatmul.bf16.vlgmr.msra.gmra.mxu1 %v78_v17  ;;  %v664_v33 = vpack.c.bf16 %v196_v27, %v195_v25  ;;  %v177_v35 = vld [vmem:[#allocation2 + $0x220] sm:$0xff] }
  0x30   :  { %946 = vmatpush.bf16.msrb.mxu1 %v668_v41  ;;  %915 = vmatmul.bf16.vlgmr.msra.gmra.mxu2 %v79_v63  ;;  %v227_v30 = vld [vmem:[#allocation2 + $0x3b0] sm:$0xff]  ;;  %v228_v31 = vld [vmem:[#allocation2 + $0x3b8] sm:$0xff]  ;;  %v672_v34 = vpack.c.bf16 %v212_v29, %v211_v28  ;;  %v178_v36 = vld [vmem:[#allocation2 + $0x228] sm:$0xff] }
  0x31   :  { %959 = vmatpush.bf16.msrb.mxu2 %v676_v42  ;;  %928 = vmatmul.bf16.vlgmr.msra.gmra.mxu3 %v80_v16  ;;  %v193_v37 = vld [vmem:[#allocation2 + $0x2a0] sm:$0xff]  ;;  %v680_v38 = vpack.c.bf16 %v228_v31, %v227_v30  ;;  %v194_v39 = vld [vmem:[#allocation2 + $0x2a8] sm:$0xff]  ;;  %v655_v44 = vpack.c.bf16 %v178_v36, %v177_v35  ;;  %v175_v47 = vld [vmem:[#allocation2 + $0x210] sm:$0xff] }
  0x32   :  { %972 = vmatpush.bf16.msrb.mxu3 %v684_v46  ;;  %v209_v40 = vld [vmem:[#allocation2 + $0x320] sm:$0xff]  ;;  %v210_v41 = vld [vmem:[#allocation2 + $0x328] sm:$0xff]  ;;  %v663_v45 = vpack.c.bf16 %v194_v39, %v193_v37  ;;  %v176_v48 = vld [vmem:[#allocation2 + $0x218] sm:$0xff] }
  0x33   :  { %934 = vmatpush.bf16.msrb.mxu0 %v659_v52  ;;  %v225_v42 = vld [vmem:[#allocation2 + $0x3a0] sm:$0xff]  ;;  %v226_v43 = vld [vmem:[#allocation2 + $0x3a8] sm:$0xff]  ;;  %v671_v46 = vpack.c.bf16 %v210_v41, %v209_v40  ;;  %v191_v49 = vld [vmem:[#allocation2 + $0x290] sm:$0xff]  ;;  %v654_v56 = vpack.c.bf16 %v176_v48, %v175_v47 }
  0x34   :  { %947 = vmatpush.bf16.msrb.mxu1 %v667_v54  ;;  %v679_v50 = vpack.c.bf16 %v226_v43, %v225_v42  ;;  %v192_v51 = vld [vmem:[#allocation2 + $0x298] sm:$0xff]  ;;  %v207_v52 = vld [vmem:[#allocation2 + $0x310] sm:$0xff]  ;;  %v173_v57 = vld [vmem:[#allocation2 + $0x200] sm:$0xff] }
  0x35   :  { %960 = vmatpush.bf16.msrb.mxu2 %v675_v55  ;;  %v208_v53 = vld [vmem:[#allocation2 + $0x318] sm:$0xff]  ;;  %v223_v54 = vld [vmem:[#allocation2 + $0x390] sm:$0xff]  ;;  %v174_v58 = vld [vmem:[#allocation2 + $0x208] sm:$0xff] }
  0x36   :  { %973 = vmatpush.bf16.msrb.mxu3 %v683_v59  ;;  %v224_v55 = vld [vmem:[#allocation2 + $0x398] sm:$0xff]  ;;  %v662_v59 = vpack.c.bf16 %v192_v51, %v191_v49  ;;  %v670_v60 = vpack.c.bf16 %v208_v53, %v207_v52  ;;  %v189_v61 = vld [vmem:[#allocation2 + $0x280] sm:$0xff]  ;;  %v190_v62 = vld [vmem:[#allocation2 + $0x288] sm:$0xff] }
  0x37   :  { %935 = vmatpush.bf16.msrb.mxu0 %v658_v2  ;;  %v205_v63 = vld [vmem:[#allocation2 + $0x300] sm:$0xff]  ;;  %v678_v0 = vpack.c.bf16 %v224_v55, %v223_v54  ;;  %v206_v1 = vld [vmem:[#allocation2 + $0x308] sm:$0xff]  ;;  %v251_v4 = vld [vmem:[#allocation2 + $0x470] sm:$0xff]  ;;  %v661_v11 = vpack.c.bf16 %v190_v62, %v189_v61 }
  0x38   :  { %948 = vmatpush.bf16.msrb.mxu1 %v666_v6  ;;  %v221_v2 = vld [vmem:[#allocation2 + $0x380] sm:$0xff]  ;;  %v222_v3 = vld [vmem:[#allocation2 + $0x388] sm:$0xff]  ;;  %v252_v5 = vld [vmem:[#allocation2 + $0x478] sm:$0xff] }
  0x39   :  { %961 = vmatpush.bf16.msrb.mxu2 %v674_v7  ;;  %v267_v6 = vld [vmem:[#allocation2 + $0x4f0] sm:$0xff]  ;;  %v653_v7 = vpack.c.bf16 %v174_v58, %v173_v57  ;;  %v268_v8 = vld [vmem:[#allocation2 + $0x4f8] sm:$0xff]  ;;  %v677_v16 = vpack.c.bf16 %v222_v3, %v221_v2  ;;  %v692_v17 = vpack.c.bf16 %v252_v5, %v251_v4  ;;  %v249_v18 = vld [vmem:[#allocation2 + $0x460] sm:$0xff] }
  0x3a   :  { %974 = vmatpush.bf16.msrb.mxu3 %v682_v12  ;;  %v283_v9 = vld [vmem:[#allocation2 + $0x570] sm:$0xff]  ;;  %v284_v10 = vld [vmem:[#allocation2 + $0x578] sm:$0xff]  ;;  %v669_v12 = vpack.c.bf16 %v206_v1, %v205_v63  ;;  %v49_v19 = vld [vmem:[%s1536_s0 + $0x20] sm:$0xff] }
  0x3b   :  { %936 = vmatpush.bf16.msrb.mxu0 %v657_v20  ;;  %v299_v13 = vld [vmem:[#allocation2 + $0x5f0] sm:$0xff]  ;;  %v300_v14 = vld [vmem:[#allocation2 + $0x5f8] sm:$0xff]  ;;  %v250_v23 = vld [vmem:[#allocation2 + $0x468] sm:$0xff] }
  0x3c   :  { %949 = vmatpush.bf16.msrb.mxu1 %v665_v21  ;;  %v51_v15 = vld [vmem:[%s1536_s0 + $0x30] sm:$0xff]  ;;  %v52_v20 = vld [vmem:[%s1536_s0 + $0x38] sm:$0xff]  ;;  %v700_v21 = vpack.c.bf16 %v268_v8, %v267_v6  ;;  %v265_v24 = vld [vmem:[#allocation2 + $0x4e0] sm:$0xff]  ;;  %v691_v35 = vpack.c.bf16 %v250_v23, %v249_v18 }
  0x3d   :  { %962 = vmatpush.bf16.msrb.mxu2 %v673_v22  ;;  %v708_v22 = vpack.c.bf16 %v284_v10, %v283_v9  ;;  %v50_v25 = vld [vmem:[%s1536_s0 + $0x28] sm:$0xff]  ;;  %v281_v28 = vld [vmem:[#allocation2 + $0x560] sm:$0xff]  ;;  %v83_v30 = vpack.c.bf16 %v51_v15, %v51_v15  ;;  %v247_v39 = vld [vmem:[#allocation2 + $0x450] sm:$0xff] }
  0x3e   :  { %975 = vmatpush.bf16.msrb.mxu3 %v681_v26  ;;  %v716_v26 = vpack.c.bf16 %v300_v14, %v299_v13  ;;  %v266_v27 = vld [vmem:[#allocation2 + $0x4e8] sm:$0xff]  ;;  %v297_v31 = vld [vmem:[#allocation2 + $0x5e0] sm:$0xff]  ;;  %v82_v36 = vpack.c.bf16 %v50_v25, %v50_v25  ;;  %v248_v40 = vld [vmem:[#allocation2 + $0x458] sm:$0xff] }
  0x3f   :  { %937 = vmatpush.bf16.msrb.mxu0 %v656_v32  ;;  %v282_v29 = vld [vmem:[#allocation2 + $0x568] sm:$0xff]  ;;  %v699_v37 = vpack.c.bf16 %v266_v27, %v265_v24  ;;  %v263_v41 = vld [vmem:[#allocation2 + $0x4d0] sm:$0xff]  ;;  %v264_v43 = vld [vmem:[#allocation2 + $0x4d8] sm:$0xff]  ;;  %v690_v48 = vpack.c.bf16 %v248_v40, %v247_v39 }
  0x40   :  { %950 = vmatpush.bf16.msrb.mxu1 %v664_v33  ;;  %v298_v32 = vld [vmem:[#allocation2 + $0x5e8] sm:$0xff]  ;;  %v81_v33 = vpack.c.bf16 %v49_v19, %v49_v19  ;;  %v296_v47 = vld [vmem:[#allocation2 + $0x5d8] sm:$0xff]  ;;  %v698_v49 = vpack.c.bf16 %v264_v43, %v263_v41  ;;  %v245_v51 = vld [vmem:[#allocation2 + $0x440] sm:$0xff] }
  0x41   :  { %963 = vmatpush.bf16.msrb.mxu2 %v672_v34  ;;  %v84_v34 = vpack.c.bf16 %v52_v20, %v52_v20  ;;  %v715_v42 = vpack.c.bf16 %v298_v32, %v297_v31  ;;  %v246_v52 = vld [vmem:[#allocation2 + $0x448] sm:$0xff]  ;;  %v261_v53 = vld [vmem:[#allocation2 + $0x4c0] sm:$0xff]  ;;  %v243_v63 = vld [vmem:[#allocation2 + $0x430] sm:$0xff] }
  0x42   :  { %976 = vmatpush.bf16.msrb.mxu3 %v680_v38  ;;  %v707_v38 = vpack.c.bf16 %v282_v29, %v281_v28  ;;  %v262_v55 = vld [vmem:[#allocation2 + $0x4c8] sm:$0xff]  ;;  %v293_v58 = vld [vmem:[#allocation2 + $0x5c0] sm:$0xff]  ;;  %v259_v1 = vld [vmem:[#allocation2 + $0x4b0] sm:$0xff] }
  0x43   :  { %938 = vmatpush.bf16.msrb.mxu0 %v655_v44  ;;  %v279_v44 = vld [vmem:[#allocation2 + $0x550] sm:$0xff]  ;;  %v278_v57 = vld [vmem:[#allocation2 + $0x548] sm:$0xff]  ;;  %v697_v61 = vpack.c.bf16 %v262_v55, %v261_v53  ;;  %v260_v3 = vld [vmem:[#allocation2 + $0x4b8] sm:$0xff] }
  0x44   :  { %951 = vmatpush.bf16.msrb.mxu1 %v663_v45  ;;  %v280_v45 = vld [vmem:[#allocation2 + $0x558] sm:$0xff]  ;;  %v275_v4 = vld [vmem:[#allocation2 + $0x530] sm:$0xff]  ;;  %v696_v9 = vpack.c.bf16 %v260_v3, %v259_v1  ;;  %v257_v13 = vld [vmem:[#allocation2 + $0x4a0] sm:$0xff] }
  0x45   :  { %964 = vmatpush.bf16.msrb.mxu2 %v671_v46  ;;  %v295_v46 = vld [vmem:[#allocation2 + $0x5d0] sm:$0xff]  ;;  %v276_v5 = vld [vmem:[#allocation2 + $0x538] sm:$0xff]  ;;  %v258_v15 = vld [vmem:[#allocation2 + $0x4a8] sm:$0xff] }
  0x46   :  { %977 = vmatpush.bf16.msrb.mxu3 %v679_v50  ;;  %v706_v50 = vpack.c.bf16 %v280_v45, %v279_v44  ;;  %v714_v54 = vpack.c.bf16 %v296_v47, %v295_v46  ;;  %v291_v6 = vld [vmem:[#allocation2 + $0x5b0] sm:$0xff]  ;;  %v704_v10 = vpack.c.bf16 %v276_v5, %v275_v4  ;;  %v289_v18 = vld [vmem:[#allocation2 + $0x5a0] sm:$0xff]  ;;  %v290_v19 = vld [vmem:[#allocation2 + $0x5a8] sm:$0xff] }
  0x47   :  { %939 = vmatpush.bf16.msrb.mxu0 %v654_v56  ;;  %v277_v56 = vld [vmem:[#allocation2 + $0x540] sm:$0xff]  ;;  %v239_v23 = vld [vmem:[#allocation2 + $0x410] sm:$0xff]  ;;  %v240_v24 = vld [vmem:[#allocation2 + $0x418] sm:$0xff] }
  0x48   :  { %952 = vmatpush.bf16.msrb.mxu1 %v662_v59  ;;  %v294_v59 = vld [vmem:[#allocation2 + $0x5c8] sm:$0xff]  ;;  %v705_v62 = vpack.c.bf16 %v278_v57, %v277_v56  ;;  %v255_v25 = vld [vmem:[#allocation2 + $0x490] sm:$0xff]  ;;  %v256_v27 = vld [vmem:[#allocation2 + $0x498] sm:$0xff]  ;;  %v686_v32 = vpack.c.bf16 %v240_v24, %v239_v23 }
  0x49   :  { %965 = vmatpush.bf16.msrb.mxu2 %v670_v60  ;;  %v689_v60 = vpack.c.bf16 %v246_v52, %v245_v51  ;;  %v713_v2 = vpack.c.bf16 %v294_v59, %v293_v58  ;;  %v271_v28 = vld [vmem:[#allocation2 + $0x510] sm:$0xff]  ;;  %v272_v29 = vld [vmem:[#allocation2 + $0x518] sm:$0xff]  ;;  %v269_v39 = vld [vmem:[#allocation2 + $0x500] sm:$0xff] }
  0x4a   :  { %978 = vmatpush.bf16.msrb.mxu3 %v678_v0  ;;  %v244_v0 = vld [vmem:[#allocation2 + $0x438] sm:$0xff]  ;;  %v270_v40 = vld [vmem:[#allocation2 + $0x508] sm:$0xff]  ;;  %v315_v44 = vld [vmem:[#allocation2 + $0x670] sm:$0xff] }
  0x4b   :  { %940 = vmatpush.bf16.msrb.mxu0 %v653_v7  ;;  %v292_v7 = vld [vmem:[#allocation2 + $0x5b8] sm:$0xff]  ;;  %v688_v8 = vpack.c.bf16 %v244_v0, %v243_v63  ;;  %v286_v43 = vld [vmem:[#allocation2 + $0x588] sm:$0xff]  ;;  %v331_v46 = vld [vmem:[#allocation2 + $0x6f0] sm:$0xff]  ;;  %v701_v52 = vpack.c.bf16 %v270_v40, %v269_v39 }
  0x4c   :  { %953 = vmatpush.bf16.msrb.mxu1 %v661_v11  ;;  %v241_v11 = vld [vmem:[#allocation2 + $0x420] sm:$0xff]  ;;  %v712_v14 = vpack.c.bf16 %v292_v7, %v291_v6  ;;  %v288_v31 = vld [vmem:[#allocation2 + $0x598] sm:$0xff]  ;;  %v363_v53 = vld [vmem:[#allocation2 + $0x7f0] sm:$0xff] }
  0x4d   :  { %966 = vmatpush.bf16.msrb.mxu2 %v669_v12  ;;  %v242_v12 = vld [vmem:[#allocation2 + $0x428] sm:$0xff]  ;;  %v316_v45 = vld [vmem:[#allocation2 + $0x678] sm:$0xff]  ;;  %v53_v55 = vld [vmem:[%s1536_s0 + $0x40] sm:$0xff] }
  0x4e   :  { %979 = vmatpush.bf16.msrb.mxu3 %v677_v16  ;;  %941 = vmatmul.bf16.vlgmr.msrb.gmra.mxu0 %v81_v33  ;;  %v273_v16 = vld [vmem:[#allocation2 + $0x520] sm:$0xff]  ;;  %v687_v20 = vpack.c.bf16 %v242_v12, %v241_v11  ;;  %v724_v57 = vpack.c.bf16 %v316_v45, %v315_v44  ;;  %v55_v58 = vld [vmem:[%s1536_s0 + $0x50] sm:$0xff]  ;;  %v54_v59 = vld [vmem:[%s1536_s0 + $0x48] sm:$0xff]  ;;  %v85_v3 = vpack.c.bf16 %v53_v55, %v53_v55 }
  0x4f   :  { %985 = vmatpush.bf16.msra.mxu0 %v692_v17  ;;  %954 = vmatmul.bf16.vlgmr.msrb.gmra.mxu1 %v82_v36  ;;  %v274_v17 = vld [vmem:[#allocation2 + $0x528] sm:$0xff]  ;;  %v237_v33 = vld [vmem:[#allocation2 + $0x400] sm:$0xff]  ;;  %v694_v36 = vpack.c.bf16 %v256_v27, %v255_v25  ;;  %v87_v7 = vpack.c.bf16 %v55_v58, %v55_v58  ;;  %v360_v23 = vld [vmem:[#allocation2 + $0x7d8] sm:$0xff] }
  0x50   :  { %998 = vmatpush.bf16.msra.mxu1 %v700_v21  ;;  %967 = vmatmul.bf16.vlgmr.msrb.gmra.mxu2 %v83_v30  ;;  %v695_v21 = vpack.c.bf16 %v258_v15, %v257_v13  ;;  %v287_v30 = vld [vmem:[#allocation2 + $0x590] sm:$0xff]  ;;  %v313_v63 = vld [vmem:[#allocation2 + $0x660] sm:$0xff]  ;;  %v314_v0 = vld [vmem:[#allocation2 + $0x668] sm:$0xff] }
  0x51   :  { %1011 = vmatpush.bf16.msra.mxu2 %v708_v22  ;;  %980 = vmatmul.bf16.vlgmr.msrb.gmra.mxu3 %v84_v34  ;;  %v703_v22 = vpack.c.bf16 %v274_v17, %v273_v16  ;;  %v238_v34 = vld [vmem:[#allocation2 + $0x408] sm:$0xff]  ;;  %v710_v41 = vpack.c.bf16 %v288_v31, %v287_v30  ;;  %v329_v1 = vld [vmem:[#allocation2 + $0x6e0] sm:$0xff]  ;;  %v723_v12 = vpack.c.bf16 %v314_v0, %v313_v63  ;;  %v311_v15 = vld [vmem:[#allocation2 + $0x650] sm:$0xff] }
  0x52   :  { %1024 = vmatpush.bf16.msra.mxu3 %v716_v26  ;;  %v711_v26 = vpack.c.bf16 %v290_v19, %v289_v18  ;;  %v685_v47 = vpack.c.bf16 %v238_v34, %v237_v33  ;;  %v330_v4 = vld [vmem:[#allocation2 + $0x6e8] sm:$0xff]  ;;  %v345_v5 = vld [vmem:[#allocation2 + $0x760] sm:$0xff]  ;;  %v312_v16 = vld [vmem:[#allocation2 + $0x658] sm:$0xff] }
  0x53   :  { %986 = vmatpush.bf16.msra.mxu0 %v691_v35  ;;  %v253_v35 = vld [vmem:[#allocation2 + $0x480] sm:$0xff]  ;;  %v346_v6 = vld [vmem:[#allocation2 + $0x768] sm:$0xff]  ;;  %v731_v13 = vpack.c.bf16 %v330_v4, %v329_v1  ;;  %v327_v17 = vld [vmem:[#allocation2 + $0x6d0] sm:$0xff]  ;;  %v722_v24 = vpack.c.bf16 %v312_v16, %v311_v15 }
  0x54   :  { %999 = vmatpush.bf16.msra.mxu1 %v699_v37  ;;  %v702_v37 = vpack.c.bf16 %v272_v29, %v271_v28  ;;  %v328_v19 = vld [vmem:[#allocation2 + $0x6d8] sm:$0xff]  ;;  %v309_v27 = vld [vmem:[#allocation2 + $0x640] sm:$0xff]  ;;  %v310_v28 = vld [vmem:[#allocation2 + $0x648] sm:$0xff] }
  0x55   :  { %1012 = vmatpush.bf16.msra.mxu2 %v707_v38  ;;  %v254_v38 = vld [vmem:[#allocation2 + $0x488] sm:$0xff]  ;;  %v730_v25 = vpack.c.bf16 %v328_v19, %v327_v17  ;;  %v325_v29 = vld [vmem:[#allocation2 + $0x6c0] sm:$0xff]  ;;  %v307_v39 = vld [vmem:[#allocation2 + $0x630] sm:$0xff] }
  0x56   :  { %1025 = vmatpush.bf16.msra.mxu3 %v715_v42  ;;  %v285_v42 = vld [vmem:[#allocation2 + $0x580] sm:$0xff]  ;;  %v693_v51 = vpack.c.bf16 %v254_v38, %v253_v35  ;;  %v326_v31 = vld [vmem:[#allocation2 + $0x6c8] sm:$0xff]  ;;  %v308_v40 = vld [vmem:[#allocation2 + $0x638] sm:$0xff] }
  0x57   :  { %987 = vmatpush.bf16.msra.mxu0 %v690_v48  ;;  %v332_v48 = vld [vmem:[#allocation2 + $0x6f8] sm:$0xff]  ;;  %v709_v56 = vpack.c.bf16 %v286_v43, %v285_v42  ;;  %v342_v33 = vld [vmem:[#allocation2 + $0x748] sm:$0xff]  ;;  %v357_v34 = vld [vmem:[#allocation2 + $0x7c0] sm:$0xff] }
  0x58   :  { %1000 = vmatpush.bf16.msra.mxu1 %v698_v49  ;;  %v347_v49 = vld [vmem:[#allocation2 + $0x770] sm:$0xff]  ;;  %v358_v35 = vld [vmem:[#allocation2 + $0x7c8] sm:$0xff]  ;;  %v324_v43 = vld [vmem:[#allocation2 + $0x6b8] sm:$0xff] }
  0x59   :  { %1013 = vmatpush.bf16.msra.mxu2 %v706_v50  ;;  %v348_v50 = vld [vmem:[#allocation2 + $0x778] sm:$0xff]  ;;  %v745_v42 = vpack.c.bf16 %v358_v35, %v357_v34  ;;  %v339_v44 = vld [vmem:[#allocation2 + $0x730] sm:$0xff]  ;;  %v322_v55 = vld [vmem:[#allocation2 + $0x6a8] sm:$0xff] }
  0x5a   :  { %1026 = vmatpush.bf16.msra.mxu3 %v714_v54  ;;  %v364_v54 = vld [vmem:[#allocation2 + $0x7f8] sm:$0xff]  ;;  %v353_v58 = vld [vmem:[#allocation2 + $0x7a0] sm:$0xff]  ;;  %v303_v63 = vld [vmem:[#allocation2 + $0x610] sm:$0xff] }
  0x5b   :  { %988 = vmatpush.bf16.msra.mxu0 %v689_v60  ;;  %v56_v60 = vld [vmem:[%s1536_s0 + $0x58] sm:$0xff]  ;;  %v319_v1 = vld [vmem:[#allocation2 + $0x690] sm:$0xff]  ;;  %v333_v15 = vld [vmem:[#allocation2 + $0x700] sm:$0xff] }
  0x5c   :  { %1001 = vmatpush.bf16.msra.mxu1 %v697_v61  ;;  %v732_v61 = vpack.c.bf16 %v332_v48, %v331_v46  ;;  %v88_v11 = vpack.c.bf16 %v56_v60, %v56_v60  ;;  %v340_v45 = vld [vmem:[#allocation2 + $0x738] sm:$0xff]  ;;  %v355_v46 = vld [vmem:[#allocation2 + $0x7b0] sm:$0xff]  ;;  %v720_v48 = vpack.c.bf16 %v308_v40, %v307_v39  ;;  %v334_v17 = vld [vmem:[#allocation2 + $0x708] sm:$0xff] }
  0x5d   :  { %1014 = vmatpush.bf16.msra.mxu2 %v705_v62  ;;  %v740_v62 = vpack.c.bf16 %v348_v50, %v347_v49  ;;  %v736_v50 = vpack.c.bf16 %v340_v45, %v339_v44  ;;  %v304_v0 = vld [vmem:[#allocation2 + $0x618] sm:$0xff]  ;;  %v335_v4 = vld [vmem:[#allocation2 + $0x710] sm:$0xff]  ;;  %v350_v19 = vld [vmem:[#allocation2 + $0x788] sm:$0xff] }
  0x5e   :  { %1027 = vmatpush.bf16.msra.mxu3 %v713_v2  ;;  %v748_v2 = vpack.c.bf16 %v364_v54, %v363_v53  ;;  %v321_v53 = vld [vmem:[#allocation2 + $0x6a0] sm:$0xff]  ;;  %v59_v34 = vld [vmem:[%s1536_s0 + $0x70] sm:$0xff]  ;;  %v58_v35 = vld [vmem:[%s1536_s0 + $0x68] sm:$0xff] }
  0x5f   :  { %989 = vmatpush.bf16.msra.mxu0 %v688_v8  ;;  %v86_v8 = vpack.c.bf16 %v54_v59, %v54_v59  ;;  %v354_v59 = vld [vmem:[#allocation2 + $0x7a8] sm:$0xff]  ;;  %v377_v39 = vld [vmem:[#allocation2 + $0x860] sm:$0xff] }
  0x60   :  { %1002 = vmatpush.bf16.msra.mxu1 %v696_v9  ;;  %v361_v9 = vld [vmem:[#allocation2 + $0x7e0] sm:$0xff]  ;;  %v378_v40 = vld [vmem:[#allocation2 + $0x868] sm:$0xff] }
  0x61   :  { %1015 = vmatpush.bf16.msra.mxu2 %v704_v10  ;;  %v362_v10 = vld [vmem:[#allocation2 + $0x7e8] sm:$0xff]  ;;  %v409_v45 = vld [vmem:[#allocation2 + $0x960] sm:$0xff] }
  0x62   :  { %1028 = vmatpush.bf16.msra.mxu3 %v712_v14  ;;  %v739_v14 = vpack.c.bf16 %v346_v6, %v345_v5  ;;  %v747_v18 = vpack.c.bf16 %v362_v10, %v361_v9  ;;  %v336_v5 = vld [vmem:[#allocation2 + $0x718] sm:$0xff]  ;;  %v351_v6 = vld [vmem:[#allocation2 + $0x790] sm:$0xff]  ;;  %v301_v9 = vld [vmem:[#allocation2 + $0x600] sm:$0xff] }
  0x63   :  { %990 = vmatpush.bf16.msra.mxu0 %v687_v20  ;;  %v343_v20 = vld [vmem:[#allocation2 + $0x750] sm:$0xff]  ;;  %v302_v10 = vld [vmem:[#allocation2 + $0x608] sm:$0xff] }
  0x64   :  { %1003 = vmatpush.bf16.msra.mxu1 %v695_v21  ;;  %v344_v21 = vld [vmem:[#allocation2 + $0x758] sm:$0xff]  ;;  %v394_v44 = vld [vmem:[#allocation2 + $0x8e8] sm:$0xff] }
  0x65   :  { %1016 = vmatpush.bf16.msra.mxu2 %v703_v22  ;;  %v359_v22 = vld [vmem:[#allocation2 + $0x7d0] sm:$0xff] }
  0x66   :  { %1029 = vmatpush.bf16.msra.mxu3 %v711_v26  ;;  %v738_v26 = vpack.c.bf16 %v344_v21, %v343_v20  ;;  %v746_v30 = vpack.c.bf16 %v360_v23, %v359_v22  ;;  %v379_v20 = vld [vmem:[#allocation2 + $0x870] sm:$0xff]  ;;  %v380_v21 = vld [vmem:[#allocation2 + $0x878] sm:$0xff]  ;;  %v717_v23 = vpack.c.bf16 %v302_v10, %v301_v9  ;;  %v406_v9 = vld [vmem:[#allocation2 + $0x948] sm:$0xff] }
  0x67   :  { %991 = vmatpush.bf16.msra.mxu0 %v686_v32  ;;  %v341_v32 = vld [vmem:[#allocation2 + $0x740] sm:$0xff]  ;;  %v395_v22 = vld [vmem:[#allocation2 + $0x8f0] sm:$0xff] }
  0x68   :  { %1004 = vmatpush.bf16.msra.mxu1 %v694_v36  ;;  %v721_v36 = vpack.c.bf16 %v310_v28, %v309_v27  ;;  %v737_v38 = vpack.c.bf16 %v342_v33, %v341_v32  ;;  %v733_v28 = vpack.c.bf16 %v334_v17, %v333_v15  ;;  %v756_v33 = vpack.c.bf16 %v380_v21, %v379_v20  ;;  %v421_v10 = vld [vmem:[#allocation2 + $0x9c0] sm:$0xff]  ;;  %v371_v15 = vld [vmem:[#allocation2 + $0x830] sm:$0xff]  ;;  %v404_v21 = vld [vmem:[#allocation2 + $0x938] sm:$0xff] }
  0x69   :  { %1017 = vmatpush.bf16.msra.mxu2 %v702_v37  ;;  %v729_v37 = vpack.c.bf16 %v326_v31, %v325_v29  ;;  %v427_v29 = vld [vmem:[#allocation2 + $0x9f0] sm:$0xff]  ;;  %v57_v31 = vld [vmem:[%s1536_s0 + $0x60] sm:$0xff] }
  0x6a   :  { %1030 = vmatpush.bf16.msra.mxu3 %v710_v41  ;;  %v323_v41 = vld [vmem:[#allocation2 + $0x6b0] sm:$0xff] }
  0x6b   :  { %992 = vmatpush.bf16.msra.mxu0 %v685_v47  ;;  %v356_v47 = vld [vmem:[#allocation2 + $0x7b8] sm:$0xff]  ;;  %v728_v49 = vpack.c.bf16 %v324_v43, %v323_v41  ;;  %v393_v41 = vld [vmem:[#allocation2 + $0x8e0] sm:$0xff]  ;;  %v89_v43 = vpack.c.bf16 %v57_v31, %v57_v31  ;;  %v387_v17 = vld [vmem:[#allocation2 + $0x8b0] sm:$0xff] }
  0x6c   :  { %1005 = vmatpush.bf16.msra.mxu1 %v693_v51  ;;  %v305_v51 = vld [vmem:[#allocation2 + $0x620] sm:$0xff]  ;;  %v744_v54 = vpack.c.bf16 %v356_v47, %v355_v46  ;;  %v410_v46 = vld [vmem:[#allocation2 + $0x968] sm:$0xff]  ;;  %v91_v47 = vpack.c.bf16 %v59_v34, %v59_v34  ;;  %v403_v20 = vld [vmem:[#allocation2 + $0x930] sm:$0xff] }
  0x6d   :  { %1018 = vmatpush.bf16.msra.mxu2 %v701_v52  ;;  %v306_v52 = vld [vmem:[#allocation2 + $0x628] sm:$0xff]  ;;  %v417_v34 = vld [vmem:[#allocation2 + $0x9a0] sm:$0xff] }
  0x6e   :  { %1031 = vmatpush.bf16.msra.mxu3 %v709_v56  ;;  %993 = vmatmul.bf16.vlgmr.msra.gmra.mxu0 %v85_v3  ;;  %v337_v56 = vld [vmem:[#allocation2 + $0x720] sm:$0xff]  ;;  %v719_v60 = vpack.c.bf16 %v306_v52, %v305_v51  ;;  %v320_v3 = vld [vmem:[#allocation2 + $0x698] sm:$0xff]  ;;  %v755_v52 = vpack.c.bf16 %v378_v40, %v377_v39  ;;  %v386_v31 = vld [vmem:[#allocation2 + $0x8a8] sm:$0xff] }
  0x6f   :  { %1037 = vmatpush.bf16.msrb.mxu0 %v724_v57  ;;  %1006 = vmatmul.bf16.vlgmr.msra.gmra.mxu1 %v86_v8  ;;  %v338_v57 = vld [vmem:[#allocation2 + $0x728] sm:$0xff]  ;;  %v718_v8 = vpack.c.bf16 %v304_v0, %v303_v63  ;;  %v424_v63 = vld [vmem:[#allocation2 + $0x9d8] sm:$0xff]  ;;  %v367_v39 = vld [vmem:[#allocation2 + $0x810] sm:$0xff] }
  0x70   :  { %1050 = vmatpush.bf16.msrb.mxu1 %v732_v61  ;;  %1019 = vmatmul.bf16.vlgmr.msra.gmra.mxu2 %v87_v7  ;;  %v727_v61 = vpack.c.bf16 %v322_v55, %v321_v53  ;;  %v352_v7 = vld [vmem:[#allocation2 + $0x798] sm:$0xff]  ;;  %v763_v53 = vpack.c.bf16 %v394_v44, %v393_v41  ;;  %v375_v55 = vld [vmem:[#allocation2 + $0x850] sm:$0xff] }
  0x71   :  { %1063 = vmatpush.bf16.msrb.mxu2 %v740_v62  ;;  %1032 = vmatmul.bf16.vlgmr.msra.gmra.mxu3 %v88_v11  ;;  %v735_v62 = vpack.c.bf16 %v338_v57, %v337_v56  ;;  %v726_v11 = vpack.c.bf16 %v320_v3, %v319_v1  ;;  %v742_v16 = vpack.c.bf16 %v352_v7, %v351_v6  ;;  %v376_v56 = vld [vmem:[#allocation2 + $0x858] sm:$0xff]  ;;  %v391_v57 = vld [vmem:[#allocation2 + $0x8d0] sm:$0xff]  ;;  %v373_v3 = vld [vmem:[#allocation2 + $0x840] sm:$0xff] }
  0x72   :  { %1076 = vmatpush.bf16.msrb.mxu3 %v748_v2  ;;  %v743_v2 = vpack.c.bf16 %v354_v59, %v353_v58  ;;  %v392_v59 = vld [vmem:[#allocation2 + $0x8d8] sm:$0xff]  ;;  %v754_v0 = vpack.c.bf16 %v376_v56, %v375_v55  ;;  %v390_v7 = vld [vmem:[#allocation2 + $0x8c8] sm:$0xff]  ;;  %v383_v41 = vld [vmem:[#allocation2 + $0x890] sm:$0xff] }
  0x73   :  { %1038 = vmatpush.bf16.msrb.mxu0 %v723_v12  ;;  %v734_v12 = vpack.c.bf16 %v336_v5, %v335_v4  ;;  %v762_v1 = vpack.c.bf16 %v392_v59, %v391_v57  ;;  %v374_v4 = vld [vmem:[#allocation2 + $0x848] sm:$0xff]  ;;  %v389_v5 = vld [vmem:[#allocation2 + $0x8c0] sm:$0xff]  ;;  %v368_v40 = vld [vmem:[#allocation2 + $0x818] sm:$0xff] }
  0x74   :  { %1051 = vmatpush.bf16.msrb.mxu1 %v731_v13  ;;  %v317_v13 = vld [vmem:[#allocation2 + $0x680] sm:$0xff]  ;;  %v399_v44 = vld [vmem:[#allocation2 + $0x910] sm:$0xff]  ;;  %v398_v57 = vld [vmem:[#allocation2 + $0x908] sm:$0xff] }
  0x75   :  { %1064 = vmatpush.bf16.msrb.mxu2 %v739_v14  ;;  %v318_v14 = vld [vmem:[#allocation2 + $0x688] sm:$0xff]  ;;  %v397_v55 = vld [vmem:[#allocation2 + $0x900] sm:$0xff] }
  0x76   :  { %1077 = vmatpush.bf16.msrb.mxu3 %v747_v18  ;;  %v349_v18 = vld [vmem:[#allocation2 + $0x780] sm:$0xff]  ;;  %v725_v27 = vpack.c.bf16 %v318_v14, %v317_v13  ;;  %v761_v13 = vpack.c.bf16 %v390_v7, %v389_v5  ;;  %v414_v59 = vld [vmem:[#allocation2 + $0x988] sm:$0xff]  ;;  %v491_v5 = vld [vmem:[#allocation2 + $0xbf0] sm:$0xff] }
  0x77   :  { %1039 = vmatpush.bf16.msrb.mxu0 %v722_v24  ;;  %v396_v24 = vld [vmem:[#allocation2 + $0x8f8] sm:$0xff]  ;;  %v741_v32 = vpack.c.bf16 %v350_v19, %v349_v18  ;;  %v61_v7 = vld [vmem:[%s1536_s0 + $0x80] sm:$0xff] }
  0x78   :  { %1052 = vmatpush.bf16.msrb.mxu1 %v730_v25  ;;  %v411_v25 = vld [vmem:[#allocation2 + $0x970] sm:$0xff]  ;;  %v388_v19 = vld [vmem:[#allocation2 + $0x8b8] sm:$0xff] }
  0x79   :  { %1065 = vmatpush.bf16.msrb.mxu2 %v738_v26  ;;  %v412_v26 = vld [vmem:[#allocation2 + $0x978] sm:$0xff] }
  0x7a   :  { %1078 = vmatpush.bf16.msrb.mxu3 %v746_v30  ;;  %v428_v30 = vld [vmem:[#allocation2 + $0x9f8] sm:$0xff] }
  0x7b   :  { %1040 = vmatpush.bf16.msrb.mxu0 %v721_v36  ;;  %v60_v36 = vld [vmem:[%s1536_s0 + $0x78] sm:$0xff] }
  0x7c   :  { %1053 = vmatpush.bf16.msrb.mxu1 %v729_v37  ;;  %v764_v37 = vpack.c.bf16 %v396_v24, %v395_v22  ;;  %v92_v51 = vpack.c.bf16 %v60_v36, %v60_v36  ;;  %v419_v22 = vld [vmem:[#allocation2 + $0x9b0] sm:$0xff] }
  0x7d   :  { %1066 = vmatpush.bf16.msrb.mxu2 %v737_v38  ;;  %v772_v38 = vpack.c.bf16 %v412_v26, %v411_v25  ;;  %v760_v25 = vpack.c.bf16 %v388_v19, %v387_v17  ;;  %v768_v26 = vpack.c.bf16 %v404_v21, %v403_v20  ;;  %v457_v17 = vld [vmem:[#allocation2 + $0xae0] sm:$0xff]  ;;  %v93_v19 = vpack.c.bf16 %v61_v7, %v61_v7  ;;  %v458_v20 = vld [vmem:[#allocation2 + $0xae8] sm:$0xff] }
  0x7e   :  { %1079 = vmatpush.bf16.msrb.mxu3 %v745_v42  ;;  %v780_v42 = vpack.c.bf16 %v428_v30, %v427_v29  ;;  %v385_v29 = vld [vmem:[#allocation2 + $0x8a0] sm:$0xff] }
  0x7f   :  { %1041 = vmatpush.bf16.msrb.mxu0 %v720_v48  ;;  %v90_v48 = vpack.c.bf16 %v58_v35, %v58_v35  ;;  %v418_v35 = vld [vmem:[#allocation2 + $0x9a8] sm:$0xff]  ;;  %v473_v21 = vld [vmem:[#allocation2 + $0xb60] sm:$0xff] }
  0x80   :  { %1054 = vmatpush.bf16.msrb.mxu1 %v728_v49  ;;  %v425_v49 = vld [vmem:[#allocation2 + $0x9e0] sm:$0xff] }
  0x81   :  { %1067 = vmatpush.bf16.msrb.mxu2 %v736_v50  ;;  %v426_v50 = vld [vmem:[#allocation2 + $0x9e8] sm:$0xff]  ;;  %v449_v7 = vld [vmem:[#allocation2 + $0xaa0] sm:$0xff] }
  0x82   :  { %1080 = vmatpush.bf16.msrb.mxu3 %v744_v54  ;;  %v771_v54 = vpack.c.bf16 %v410_v46, %v409_v45  ;;  %v779_v58 = vpack.c.bf16 %v426_v50, %v425_v49  ;;  %v400_v45 = vld [vmem:[#allocation2 + $0x918] sm:$0xff]  ;;  %v415_v46 = vld [vmem:[#allocation2 + $0x990] sm:$0xff]  ;;  %v365_v49 = vld [vmem:[#allocation2 + $0x800] sm:$0xff] }
  0x83   :  { %1042 = vmatpush.bf16.msrb.mxu0 %v719_v60  ;;  %v407_v60 = vld [vmem:[#allocation2 + $0x950] sm:$0xff]  ;;  %v366_v50 = vld [vmem:[#allocation2 + $0x808] sm:$0xff] }
  0x84   :  { %1055 = vmatpush.bf16.msrb.mxu1 %v727_v61  ;;  %v408_v61 = vld [vmem:[#allocation2 + $0x958] sm:$0xff] }
  0x85   :  { %1068 = vmatpush.bf16.msrb.mxu2 %v735_v62  ;;  %v423_v62 = vld [vmem:[#allocation2 + $0x9d0] sm:$0xff] }
  0x86   :  { %1081 = vmatpush.bf16.msrb.mxu3 %v743_v2  ;;  %v770_v2 = vpack.c.bf16 %v408_v61, %v407_v60  ;;  %v778_v6 = vpack.c.bf16 %v424_v63, %v423_v62  ;;  %v443_v60 = vld [vmem:[#allocation2 + $0xa70] sm:$0xff]  ;;  %v444_v61 = vld [vmem:[#allocation2 + $0xa78] sm:$0xff]  ;;  %v749_v63 = vpack.c.bf16 %v366_v50, %v365_v49  ;;  %v470_v49 = vld [vmem:[#allocation2 + $0xb48] sm:$0xff] }
  0x87   :  { %1043 = vmatpush.bf16.msrb.mxu0 %v718_v8  ;;  %v405_v8 = vld [vmem:[#allocation2 + $0x940] sm:$0xff]  ;;  %v459_v62 = vld [vmem:[#allocation2 + $0xaf0] sm:$0xff] }
  0x88   :  { %1056 = vmatpush.bf16.msrb.mxu1 %v726_v11  ;;  %v422_v11 = vld [vmem:[#allocation2 + $0x9c8] sm:$0xff]  ;;  %v769_v14 = vpack.c.bf16 %v406_v9, %v405_v8  ;;  %v788_v9 = vpack.c.bf16 %v444_v61, %v443_v60  ;;  %v485_v50 = vld [vmem:[#allocation2 + $0xbc0] sm:$0xff]  ;;  %v452_v60 = vld [vmem:[#allocation2 + $0xab8] sm:$0xff] }
  0x89   :  { %1069 = vmatpush.bf16.msrb.mxu2 %v734_v12  ;;  %v753_v12 = vpack.c.bf16 %v374_v4, %v373_v3  ;;  %v777_v18 = vpack.c.bf16 %v422_v11, %v421_v10  ;;  %v765_v4 = vpack.c.bf16 %v398_v57, %v397_v55  ;;  %v63_v10 = vld [vmem:[%s1536_s0 + $0x90] sm:$0xff]  ;;  %v62_v11 = vld [vmem:[%s1536_s0 + $0x88] sm:$0xff] }
  0x8a   :  { %1082 = vmatpush.bf16.msrb.mxu3 %v742_v16  ;;  %v372_v16 = vld [vmem:[#allocation2 + $0x838] sm:$0xff]  ;;  %v451_v57 = vld [vmem:[#allocation2 + $0xab0] sm:$0xff] }
  0x8b   :  { %1044 = vmatpush.bf16.msrb.mxu0 %v717_v23  ;;  %v420_v23 = vld [vmem:[#allocation2 + $0x9b8] sm:$0xff]  ;;  %v752_v24 = vpack.c.bf16 %v372_v16, %v371_v15  ;;  %v441_v15 = vld [vmem:[#allocation2 + $0xa60] sm:$0xff]  ;;  %v442_v16 = vld [vmem:[#allocation2 + $0xa68] sm:$0xff] }
  0x8c   :  { %1057 = vmatpush.bf16.msrb.mxu1 %v725_v27  ;;  %v369_v27 = vld [vmem:[#allocation2 + $0x820] sm:$0xff]  ;;  %v776_v30 = vpack.c.bf16 %v420_v23, %v419_v22  ;;  %v474_v22 = vld [vmem:[#allocation2 + $0xb68] sm:$0xff]  ;;  %v95_v23 = vpack.c.bf16 %v63_v10, %v63_v10  ;;  %v467_v61 = vld [vmem:[#allocation2 + $0xb30] sm:$0xff] }
  0x8d   :  { %1070 = vmatpush.bf16.msrb.mxu2 %v733_v28  ;;  %v370_v28 = vld [vmem:[#allocation2 + $0x828] sm:$0xff] }
  0x8e   :  { %1083 = vmatpush.bf16.msrb.mxu3 %v741_v32  ;;  %1045 = vmatmul.bf16.vlgmr.msrb.gmra.mxu0 %v89_v43  ;;  %v401_v32 = vld [vmem:[#allocation2 + $0x920] sm:$0xff]  ;;  %v751_v36 = vpack.c.bf16 %v370_v28, %v369_v27  ;;  %v384_v43 = vld [vmem:[#allocation2 + $0x898] sm:$0xff]  ;;  %v787_v28 = vpack.c.bf16 %v442_v16, %v441_v15  ;;  %v450_v10 = vld [vmem:[#allocation2 + $0xaa8] sm:$0xff] }
  0x8f   :  { %1089 = vmatpush.bf16.msra.mxu0 %v756_v33  ;;  %1058 = vmatmul.bf16.vlgmr.msrb.gmra.mxu1 %v90_v48  ;;  %v402_v33 = vld [vmem:[#allocation2 + $0x928] sm:$0xff]  ;;  %v750_v48 = vpack.c.bf16 %v368_v40, %v367_v39  ;;  %v488_v39 = vld [vmem:[#allocation2 + $0xbd8] sm:$0xff] }
  0x90   :  { %1102 = vmatpush.bf16.msra.mxu1 %v764_v37  ;;  %1071 = vmatmul.bf16.vlgmr.msrb.gmra.mxu2 %v91_v47  ;;  %v759_v37 = vpack.c.bf16 %v386_v31, %v385_v29  ;;  %v416_v47 = vld [vmem:[#allocation2 + $0x998] sm:$0xff]  ;;  %v795_v29 = vpack.c.bf16 %v458_v20, %v457_v17  ;;  %v439_v31 = vld [vmem:[#allocation2 + $0xa50] sm:$0xff] }
  0x91   :  { %1115 = vmatpush.bf16.msra.mxu2 %v772_v38  ;;  %1084 = vmatmul.bf16.vlgmr.msrb.gmra.mxu3 %v92_v51  ;;  %v767_v38 = vpack.c.bf16 %v402_v33, %v401_v32  ;;  %v758_v51 = vpack.c.bf16 %v384_v43, %v383_v41  ;;  %v774_v56 = vpack.c.bf16 %v416_v47, %v415_v46  ;;  %v440_v32 = vld [vmem:[#allocation2 + $0xa58] sm:$0xff]  ;;  %v455_v33 = vld [vmem:[#allocation2 + $0xad0] sm:$0xff]  ;;  %v437_v43 = vld [vmem:[#allocation2 + $0xa40] sm:$0xff] }
  0x92   :  { %1128 = vmatpush.bf16.msra.mxu3 %v780_v42  ;;  %v775_v42 = vpack.c.bf16 %v418_v35, %v417_v34  ;;  %v456_v35 = vld [vmem:[#allocation2 + $0xad8] sm:$0xff]  ;;  %v786_v40 = vpack.c.bf16 %v440_v32, %v439_v31  ;;  %v454_v47 = vld [vmem:[#allocation2 + $0xac8] sm:$0xff] }
  0x93   :  { %1090 = vmatpush.bf16.msra.mxu0 %v755_v52  ;;  %v766_v52 = vpack.c.bf16 %v400_v45, %v399_v44  ;;  %v794_v41 = vpack.c.bf16 %v456_v35, %v455_v33  ;;  %v438_v44 = vld [vmem:[#allocation2 + $0xa48] sm:$0xff]  ;;  %v453_v45 = vld [vmem:[#allocation2 + $0xac0] sm:$0xff] }
  0x94   :  { %1103 = vmatpush.bf16.msra.mxu1 %v763_v53  ;;  %v381_v53 = vld [vmem:[#allocation2 + $0x880] sm:$0xff] }
  0x95   :  { %1116 = vmatpush.bf16.msra.mxu2 %v771_v54  ;;  %v382_v54 = vld [vmem:[#allocation2 + $0x888] sm:$0xff]  ;;  %v429_v33 = vld [vmem:[#allocation2 + $0xa00] sm:$0xff] }
  0x96   :  { %1129 = vmatpush.bf16.msra.mxu3 %v779_v58  ;;  %v413_v58 = vld [vmem:[#allocation2 + $0x980] sm:$0xff]  ;;  %v757_v3 = vpack.c.bf16 %v382_v54, %v381_v53  ;;  %v435_v53 = vld [vmem:[#allocation2 + $0xa30] sm:$0xff]  ;;  %v793_v54 = vpack.c.bf16 %v454_v47, %v453_v45  ;;  %v478_v45 = vld [vmem:[#allocation2 + $0xb88] sm:$0xff] }
  0x97   :  { %1091 = vmatpush.bf16.msra.mxu0 %v754_v0  ;;  %v460_v0 = vld [vmem:[#allocation2 + $0xaf8] sm:$0xff]  ;;  %v773_v8 = vpack.c.bf16 %v414_v59, %v413_v58  ;;  %v1321_v58 = vld [vmem:[#allocation5] ss:$0 sm:$0xff] }
  0x98   :  { %1104 = vmatpush.bf16.msra.mxu1 %v762_v1  ;;  %v475_v1 = vld [vmem:[#allocation2 + $0xb70] sm:$0xff]  ;;  %v508_v47 = vld [vmem:[#allocation2 + $0xc78] sm:$0xff] }
  0x99   :  { %1117 = vmatpush.bf16.msra.mxu2 %v770_v2  ;;  %v476_v2 = vld [vmem:[#allocation2 + $0xb78] sm:$0xff] }
  0x9a   :  { %1130 = vmatpush.bf16.msra.mxu3 %v778_v6  ;;  %v492_v6 = vld [vmem:[#allocation2 + $0xbf8] sm:$0xff] }
  0x9b   :  { %1092 = vmatpush.bf16.msra.mxu0 %v753_v12  ;;  %v64_v12 = vld [vmem:[%s1536_s0 + $0x98] sm:$0xff] }
  0x9c   :  { %1105 = vmatpush.bf16.msra.mxu1 %v761_v13  ;;  %v796_v13 = vpack.c.bf16 %v460_v0, %v459_v62  ;;  %v96_v27 = vpack.c.bf16 %v64_v12, %v64_v12  ;;  %v468_v62 = vld [vmem:[#allocation2 + $0xb38] sm:$0xff]  ;;  %v466_v12 = vld [vmem:[#allocation2 + $0xb28] sm:$0xff] }
  0x9d   :  { %1118 = vmatpush.bf16.msra.mxu2 %v769_v14  ;;  %v804_v14 = vpack.c.bf16 %v476_v2, %v475_v1  ;;  %v484_v0 = vld [vmem:[#allocation2 + $0xbb8] sm:$0xff] }
  0x9e   :  { %1131 = vmatpush.bf16.msra.mxu3 %v777_v18  ;;  %v812_v18 = vpack.c.bf16 %v492_v6, %v491_v5  ;;  %v433_v5 = vld [vmem:[#allocation2 + $0xa20] sm:$0xff]  ;;  %v434_v6 = vld [vmem:[#allocation2 + $0xa28] sm:$0xff] }
  0x9f   :  { %1093 = vmatpush.bf16.msra.mxu0 %v752_v24  ;;  %v94_v24 = vpack.c.bf16 %v62_v11, %v62_v11  ;;  %v465_v11 = vld [vmem:[#allocation2 + $0xb20] sm:$0xff]  ;;  %v783_v17 = vpack.c.bf16 %v434_v6, %v433_v5 }
  0xa0   :  { %1106 = vmatpush.bf16.msra.mxu1 %v760_v25  ;;  %v489_v25 = vld [vmem:[#allocation2 + $0xbe0] sm:$0xff]  ;;  %v799_v20 = vpack.c.bf16 %v466_v12, %v465_v11  ;;  %v538_v11 = vld [vmem:[#allocation2 + $0xd68] sm:$0xff] }
  0xa1   :  { %1119 = vmatpush.bf16.msra.mxu2 %v768_v26  ;;  %v490_v26 = vld [vmem:[#allocation2 + $0xbe8] sm:$0xff]  ;;  %v521_v5 = vld [vmem:[#allocation2 + $0xce0] sm:$0xff] }
  0xa2   :  { %1132 = vmatpush.bf16.msra.mxu3 %v776_v30  ;;  %v803_v30 = vpack.c.bf16 %v474_v22, %v473_v21  ;;  %v811_v34 = vpack.c.bf16 %v490_v26, %v489_v25  ;;  %v431_v21 = vld [vmem:[#allocation2 + $0xa10] sm:$0xff]  ;;  %v432_v22 = vld [vmem:[#allocation2 + $0xa18] sm:$0xff] }
  0xa3   :  { %1094 = vmatpush.bf16.msra.mxu0 %v751_v36  ;;  %v471_v36 = vld [vmem:[#allocation2 + $0xb50] sm:$0xff]  ;;  %v448_v25 = vld [vmem:[#allocation2 + $0xa98] sm:$0xff]  ;;  %v782_v32 = vpack.c.bf16 %v432_v22, %v431_v21 }
  0xa4   :  { %1107 = vmatpush.bf16.msra.mxu1 %v759_v37  ;;  %v472_v37 = vld [vmem:[#allocation2 + $0xb58] sm:$0xff]  ;;  %v463_v26 = vld [vmem:[#allocation2 + $0xb10] sm:$0xff] }
  0xa5   :  { %1120 = vmatpush.bf16.msra.mxu2 %v767_v38  ;;  %v487_v38 = vld [vmem:[#allocation2 + $0xbd0] sm:$0xff]  ;;  %v504_v21 = vld [vmem:[#allocation2 + $0xc58] sm:$0xff] }
  0xa6   :  { %1133 = vmatpush.bf16.msra.mxu3 %v775_v42  ;;  %v802_v42 = vpack.c.bf16 %v472_v37, %v471_v36  ;;  %v810_v46 = vpack.c.bf16 %v488_v39, %v487_v38  ;;  %v445_v39 = vld [vmem:[#allocation2 + $0xa80] sm:$0xff]  ;;  %v519_v22 = vld [vmem:[#allocation2 + $0xcd0] sm:$0xff] }
  0xa7   :  { %1095 = vmatpush.bf16.msra.mxu0 %v750_v48  ;;  %v469_v48 = vld [vmem:[#allocation2 + $0xb40] sm:$0xff] }
  0xa8   :  { %1108 = vmatpush.bf16.msra.mxu1 %v758_v51  ;;  %v486_v51 = vld [vmem:[#allocation2 + $0xbc8] sm:$0xff]  ;;  %v801_v55 = vpack.c.bf16 %v470_v49, %v469_v48  ;;  %v523_v48 = vld [vmem:[#allocation2 + $0xcf0] sm:$0xff] }
  0xa9   :  { %1121 = vmatpush.bf16.msra.mxu2 %v766_v52  ;;  %v785_v52 = vpack.c.bf16 %v438_v44, %v437_v43  ;;  %v809_v59 = vpack.c.bf16 %v486_v51, %v485_v50  ;;  %v462_v43 = vld [vmem:[#allocation2 + $0xb08] sm:$0xff]  ;;  %v477_v44 = vld [vmem:[#allocation2 + $0xb80] sm:$0xff] }
  0xaa   :  { %1134 = vmatpush.bf16.msra.mxu3 %v774_v56  ;;  %v436_v56 = vld [vmem:[#allocation2 + $0xa38] sm:$0xff] }
  0xab   :  { %1096 = vmatpush.bf16.msra.mxu0 %v749_v63  ;;  %v483_v63 = vld [vmem:[#allocation2 + $0xbb0] sm:$0xff]  ;;  %v784_v1 = vpack.c.bf16 %v436_v56, %v435_v53  ;;  %v890_v2 = vpop.f32.mrf.mxu0 }
  0xac   :  { %1109 = vmatpush.bf16.msra.mxu1 %v757_v3  ;;  %v792_v3 = vpack.c.bf16 %v452_v60, %v451_v57  ;;  %v903_v15 = vpop.f32.mrf.mxu1  ;;  %v539_v53 = vld [vmem:[#allocation2 + $0xd70] sm:$0xff]  ;;  %v805_v60 = vpack.c.bf16 %v478_v45, %v477_v44 }
  0xad   :  { %1122 = vmatpush.bf16.msra.mxu2 %v765_v4  ;;  %v800_v4 = vpack.c.bf16 %v468_v62, %v467_v61  ;;  %v555_v57 = vld [vmem:[#allocation2 + $0xdf0] sm:$0xff] }
  0xae   :  { %1135 = vmatpush.bf16.msra.mxu3 %v773_v8  ;;  %1097 = vmatmul.bf16.vlgmr.msra.gmra.mxu0 %v93_v19  ;;  %v891_v8 = vadd.f32 %v1321_v58, %v890_v2  ;;  %v791_v19 = vpack.c.bf16 %v450_v10, %v449_v7  ;;  %v556_v58 = vld [vmem:[#allocation2 + $0xdf8] sm:$0xff]  ;;  %v67_v62 = vld [vmem:[%s1536_s0 + $0xb0] sm:$0xff]  ;;  %v537_v10 = vld [vmem:[#allocation2 + $0xd60] sm:$0xff] }
  0xaf   :  { %1141 = vmatpush.bf16.msrb.mxu0 %v788_v9  ;;  %1110 = vmatmul.bf16.vlgmr.msra.gmra.mxu1 %v94_v24  ;;  %v808_v9 = vpack.c.bf16 %v484_v0, %v483_v63  ;;  %v66_v63 = vld [vmem:[%s1536_s0 + $0xa8] sm:$0xff]  ;;  %v68_v0 = vld [vmem:[%s1536_s0 + $0xb8] sm:$0xff]  ;;  %v844_v7 = vpack.c.bf16 %v556_v58, %v555_v57  ;;  %v99_v12 = vpack.c.bf16 %v67_v62, %v67_v62 }
  0xb0   :  { %1154 = vmatpush.bf16.msrb.mxu1 %v796_v13  ;;  %1123 = vmatmul.bf16.vlgmr.msra.gmra.mxu2 %v95_v23  ;;  %v481_v13 = vld [vmem:[#allocation2 + $0xba0] sm:$0xff]  ;;  %v447_v23 = vld [vmem:[#allocation2 + $0xa90] sm:$0xff]  ;;  %v498_v62 = vld [vmem:[#allocation2 + $0xc28] sm:$0xff] }
  0xb1   :  { %1167 = vmatpush.bf16.msrb.mxu2 %v804_v14  ;;  %1136 = vmatmul.bf16.vlgmr.msra.gmra.mxu3 %v96_v27  ;;  %v482_v14 = vld [vmem:[#allocation2 + $0xba8] sm:$0xff]  ;;  %v464_v27 = vld [vmem:[#allocation2 + $0xb18] sm:$0xff]  ;;  %v790_v37 = vpack.c.bf16 %v448_v25, %v447_v23  ;;  %v535_v25 = vld [vmem:[#allocation2 + $0xd50] sm:$0xff] }
  0xb2   :  { %1180 = vmatpush.bf16.msrb.mxu3 %v812_v18  ;;  %v904_v18 = vadd.f32 %v903_v15, %v891_v8  ;;  %v807_v24 = vpack.c.bf16 %v482_v14, %v481_v13  ;;  %v798_v38 = vpack.c.bf16 %v464_v27, %v463_v26  ;;  %v98_v13 = vpack.c.bf16 %v66_v63, %v66_v63  ;;  %v553_v14 = vld [vmem:[#allocation2 + $0xde0] sm:$0xff]  ;;  %v554_v15 = vld [vmem:[#allocation2 + $0xde8] sm:$0xff]  ;;  %v536_v26 = vld [vmem:[#allocation2 + $0xd58] sm:$0xff] }
  0xb3   :  { %1142 = vmatpush.bf16.msrb.mxu0 %v787_v28  ;;  %v916_v16 = vpop.f32.mrf.mxu2  ;;  %v892_v36 = vpop.f32.mrf.mxu0  ;;  %v843_v23 = vpack.c.bf16 %v554_v15, %v553_v14  ;;  %v551_v27 = vld [vmem:[#allocation2 + $0xdd0] sm:$0xff]  ;;  %v513_v63 = vld [vmem:[#allocation2 + $0xca0] sm:$0xff]  ;;  %v496_v14 = vld [vmem:[#allocation2 + $0xc18] sm:$0xff] }
  0xb4   :  { %1155 = vmatpush.bf16.msrb.mxu1 %v795_v29  ;;  %v917_v28 = vadd.f32 %v916_v16, %v904_v18  ;;  %v479_v29 = vld [vmem:[#allocation2 + $0xb90] sm:$0xff]  ;;  %v929_v31 = vpop.f32.mrf.mxu3  ;;  %v905_v49 = vpop.f32.mrf.mxu1  ;;  %v100_v16 = vpack.c.bf16 %v68_v0, %v68_v0 }
  0xb5   :  { %1168 = vmatpush.bf16.msrb.mxu2 %v803_v30  ;;  %v480_v30 = vld [vmem:[#allocation2 + $0xb98] sm:$0xff]  ;;  %v511_v15 = vld [vmem:[#allocation2 + $0xc90] sm:$0xff] }
  0xb6   :  { %1181 = vmatpush.bf16.msrb.mxu3 %v811_v34  ;;  %v430_v34 = vld [vmem:[#allocation2 + $0xa08] sm:$0xff]  ;;  %v1491_v35 = vadd.f32 %v929_v31, %v917_v28  ;;  %v552_v28 = vld [vmem:[#allocation2 + $0xdd8] sm:$0xff]  ;;  %v834_v31 = vpack.c.bf16 %v536_v26, %v535_v25 }
  0xb7   :  { %1143 = vmatpush.bf16.msrb.mxu0 %v786_v40  ;;  %v446_v40 = vld [vmem:[#allocation2 + $0xa88] sm:$0xff]  ;;  %v781_v51 = vpack.c.bf16 %v430_v34, %v429_v33  ;;  %v517_v34 = vld [vmem:[#allocation2 + $0xcc0] sm:$0xff]  ;;  %v842_v36 = vpack.c.bf16 %v552_v28, %v551_v27 }
  0xb8   :  { %1156 = vmatpush.bf16.msrb.mxu1 %v794_v41  ;;  %v461_v41 = vld [vmem:[#allocation2 + $0xb00] sm:$0xff]  ;;  %v502_v33 = vld [vmem:[#allocation2 + $0xc48] sm:$0xff] }
  0xb9   :  { %1169 = vmatpush.bf16.msrb.mxu2 %v802_v42  ;;  %v806_v42 = vpack.c.bf16 %v480_v30, %v479_v29  ;;  %v797_v56 = vpack.c.bf16 %v462_v43, %v461_v41  ;;  %v550_v41 = vld [vmem:[#allocation2 + $0xdc8] sm:$0xff]  ;;  %v509_v28 = vld [vmem:[#allocation2 + $0xc80] sm:$0xff] }
  0xba   :  { %1182 = vmatpush.bf16.msrb.mxu3 %v810_v46  ;;  %v507_v46 = vld [vmem:[#allocation2 + $0xc70] sm:$0xff]  ;;  %v494_v25 = vld [vmem:[#allocation2 + $0xc08] sm:$0xff] }
  0xbb   :  { %1144 = vmatpush.bf16.msrb.mxu0 %v785_v52  ;;  %v918_v50 = vpop.f32.mrf.mxu2  ;;  %v524_v52 = vld [vmem:[#allocation2 + $0xcf8] sm:$0xff]  ;;  %v820_v61 = vpack.c.bf16 %v508_v47, %v507_v46  ;;  %v499_v46 = vld [vmem:[#allocation2 + $0xc30] sm:$0xff] }
  0xbc   :  { %1157 = vmatpush.bf16.msrb.mxu1 %v793_v54  ;;  %v540_v54 = vld [vmem:[#allocation2 + $0xd78] sm:$0xff]  ;;  %v931_v6 = vpop.f32.mrf.mxu3 }
  0xbd   :  { %1170 = vmatpush.bf16.msrb.mxu2 %v801_v55  ;;  %v789_v55 = vpack.c.bf16 %v446_v40, %v445_v39  ;;  %v836_v2 = vpack.c.bf16 %v540_v54, %v539_v53  ;;  %v534_v39 = vld [vmem:[#allocation2 + $0xd48] sm:$0xff]  ;;  %v549_v40 = vld [vmem:[#allocation2 + $0xdc0] sm:$0xff]  ;;  %v500_v47 = vld [vmem:[#allocation2 + $0xc38] sm:$0xff] }
  0xbe   :  { %1183 = vmatpush.bf16.msrb.mxu3 %v809_v59  ;;  %v65_v59 = vld [vmem:[%s1536_s0 + $0xa0] sm:$0xff]  ;;  %v531_v53 = vld [vmem:[#allocation2 + $0xd30] sm:$0xff]  ;;  %v532_v54 = vld [vmem:[#allocation2 + $0xd38] sm:$0xff]  ;;  %v816_v58 = vpack.c.bf16 %v500_v47, %v499_v46 }
  0xbf   :  { %1145 = vmatpush.bf16.msrb.mxu0 %v784_v1  ;;  %v828_v1 = vpack.c.bf16 %v524_v52, %v523_v48  ;;  %v97_v8 = vpack.c.bf16 %v65_v59, %v65_v59  ;;  %v515_v48 = vld [vmem:[#allocation2 + $0xcb0] sm:$0xff]  ;;  %v516_v52 = vld [vmem:[#allocation2 + $0xcb8] sm:$0xff]  ;;  %v545_v6 = vld [vmem:[#allocation2 + $0xda0] sm:$0xff] }
  0xc0   :  { %1158 = vmatpush.bf16.msrb.mxu1 %v792_v3  ;;  %v505_v3 = vld [vmem:[#allocation2 + $0xc60] sm:$0xff]  ;;  %v824_v59 = vpack.c.bf16 %v516_v52, %v515_v48  ;;  %v619_v47 = vld [vmem:[#allocation2 + $0xff0] sm:$0xff]  ;;  %v620_v48 = vld [vmem:[#allocation2 + $0xff8] sm:$0xff] }
  0xc1   :  { %1171 = vmatpush.bf16.msrb.mxu2 %v800_v4  ;;  %v506_v4 = vld [vmem:[#allocation2 + $0xc68] sm:$0xff]  ;;  %v71_v52 = vld [vmem:[%s1536_s0 + $0xd0] sm:$0xff] }
  0xc2   :  { %1184 = vmatpush.bf16.msrb.mxu3 %v808_v9  ;;  %v522_v9 = vld [vmem:[#allocation2 + $0xce8] sm:$0xff] }
  0xc3   :  { %1146 = vmatpush.bf16.msrb.mxu0 %v783_v17  ;;  %v819_v17 = vpack.c.bf16 %v506_v4, %v505_v3  ;;  %v827_v18 = vpack.c.bf16 %v522_v9, %v521_v5  ;;  %v530_v3 = vld [vmem:[#allocation2 + $0xd28] sm:$0xff] }
  0xc4   :  { %1159 = vmatpush.bf16.msrb.mxu1 %v791_v19  ;;  %v835_v19 = vpack.c.bf16 %v538_v11, %v537_v10 }
  0xc5   :  { %1172 = vmatpush.bf16.msrb.mxu2 %v799_v20  ;;  %v503_v20 = vld [vmem:[#allocation2 + $0xc50] sm:$0xff] }
  0xc6   :  { %1185 = vmatpush.bf16.msrb.mxu3 %v807_v24  ;;  %v520_v24 = vld [vmem:[#allocation2 + $0xcd8] sm:$0xff]  ;;  %v818_v29 = vpack.c.bf16 %v504_v21, %v503_v20  ;;  %v543_v21 = vld [vmem:[#allocation2 + $0xd90] sm:$0xff] }
  0xc7   :  { %1147 = vmatpush.bf16.msrb.mxu0 %v782_v32  ;;  %v826_v30 = vpack.c.bf16 %v520_v24, %v519_v22  ;;  %v501_v32 = vld [vmem:[#allocation2 + $0xc40] sm:$0xff]  ;;  %v528_v20 = vld [vmem:[#allocation2 + $0xd18] sm:$0xff] }
  0xc8   :  { %1160 = vmatpush.bf16.msrb.mxu1 %v790_v37  ;;  %v518_v37 = vld [vmem:[#allocation2 + $0xcc8] sm:$0xff]  ;;  %v544_v22 = vld [vmem:[#allocation2 + $0xd98] sm:$0xff]  ;;  %v493_v24 = vld [vmem:[#allocation2 + $0xc00] sm:$0xff] }
  0xc9   :  { %1173 = vmatpush.bf16.msrb.mxu2 %v798_v38  ;;  %v533_v38 = vld [vmem:[#allocation2 + $0xd40] sm:$0xff]  ;;  %v825_v44 = vpack.c.bf16 %v518_v37, %v517_v34 }
  0xca   :  { %1186 = vmatpush.bf16.msrb.mxu3 %v806_v42  ;;  %v817_v42 = vpack.c.bf16 %v502_v33, %v501_v32  ;;  %v833_v45 = vpack.c.bf16 %v534_v39, %v533_v38  ;;  %v838_v32 = vpack.c.bf16 %v544_v22, %v543_v21  ;;  %v526_v33 = vld [vmem:[#allocation2 + $0xd08] sm:$0xff]  ;;  %v541_v34 = vld [vmem:[#allocation2 + $0xd80] sm:$0xff]  ;;  %v571_v38 = vld [vmem:[#allocation2 + $0xe70] sm:$0xff] }
  0xcb   :  { %1148 = vmatpush.bf16.msrb.mxu0 %v781_v51  ;;  %v942_v43 = vpop.f32.mrf.mxu0  ;;  %v841_v51 = vpack.c.bf16 %v550_v41, %v549_v40  ;;  %v572_v39 = vld [vmem:[#allocation2 + $0xe78] sm:$0xff]  ;;  %v587_v40 = vld [vmem:[#allocation2 + $0xef0] sm:$0xff]  ;;  %v813_v41 = vpack.c.bf16 %v494_v25, %v493_v24  ;;  %v565_v21 = vld [vmem:[#allocation2 + $0xe40] sm:$0xff] }
  0xcc   :  { %1161 = vmatpush.bf16.msrb.mxu1 %v789_v55  ;;  %v943_v49 = vadd.f32 %v942_v43, %v1491_v35  ;;  %v955_v50 = vpop.f32.mrf.mxu1  ;;  %v547_v55 = vld [vmem:[#allocation2 + $0xdb0] sm:$0xff]  ;;  %v566_v22 = vld [vmem:[#allocation2 + $0xe48] sm:$0xff] }
  0xcd   :  { %1174 = vmatpush.bf16.msrb.mxu2 %v797_v56  ;;  %v548_v56 = vld [vmem:[#allocation2 + $0xdb8] sm:$0xff]  ;;  %v603_v43 = vld [vmem:[#allocation2 + $0xf70] sm:$0xff]  ;;  %v582_v25 = vld [vmem:[#allocation2 + $0xec8] sm:$0xff] }
  0xce   :  { %1187 = vmatpush.bf16.msrb.mxu3 %v805_v60  ;;  %1149 = vmatmul.bf16.vlgmr.msrb.gmra.mxu0 %v97_v8  ;;  %v956_v57 = vadd.f32 %v955_v50, %v943_v49  ;;  %v832_v60 = vpack.c.bf16 %v532_v54, %v531_v53  ;;  %v840_v35 = vpack.c.bf16 %v548_v56, %v547_v55  ;;  %v69_v49 = vld [vmem:[%s1536_s0 + $0xc0] sm:$0xff]  ;;  %v70_v53 = vld [vmem:[%s1536_s0 + $0xc8] sm:$0xff]  ;;  %v72_v54 = vld [vmem:[%s1536_s0 + $0xd8] sm:$0xff] }
  0xcf   :  { %1193 = vmatpush.bf16.msra.mxu0 %v820_v61  ;;  %1162 = vmatmul.bf16.vlgmr.msrb.gmra.mxu1 %v98_v13  ;;  %v497_v61 = vld [vmem:[#allocation2 + $0xc20] sm:$0xff]  ;;  %v495_v13 = vld [vmem:[#allocation2 + $0xc10] sm:$0xff] }
  0xd0   :  { %1206 = vmatpush.bf16.msra.mxu1 %v828_v1  ;;  %1175 = vmatmul.bf16.vlgmr.msrb.gmra.mxu2 %v99_v12  ;;  %v514_v1 = vld [vmem:[#allocation2 + $0xca8] sm:$0xff]  ;;  %v815_v8 = vpack.c.bf16 %v498_v62, %v497_v61  ;;  %v101_v61 = vpack.c.bf16 %v69_v49, %v69_v49  ;;  %v561_v49 = vld [vmem:[#allocation2 + $0xe20] sm:$0xff] }
  0xd1   :  { %1219 = vmatpush.bf16.msra.mxu2 %v836_v2  ;;  %1188 = vmatmul.bf16.vlgmr.msrb.gmra.mxu3 %v100_v16  ;;  %v529_v2 = vld [vmem:[#allocation2 + $0xd20] sm:$0xff]  ;;  %v823_v11 = vpack.c.bf16 %v514_v1, %v513_v63  ;;  %v586_v62 = vld [vmem:[#allocation2 + $0xee8] sm:$0xff]  ;;  %v102_v1 = vpack.c.bf16 %v70_v53, %v70_v53 }
  0xd2   :  { %1232 = vmatpush.bf16.msra.mxu3 %v844_v7  ;;  %v546_v7 = vld [vmem:[#allocation2 + $0xda8] sm:$0xff]  ;;  %v831_v12 = vpack.c.bf16 %v530_v3, %v529_v2  ;;  %v601_v63 = vld [vmem:[#allocation2 + $0xf60] sm:$0xff] }
  0xd3   :  { %1194 = vmatpush.bf16.msra.mxu0 %v819_v17  ;;  %v968_v0 = vpop.f32.mrf.mxu2  ;;  %v944_v10 = vpop.f32.mrf.mxu0  ;;  %v839_v17 = vpack.c.bf16 %v546_v7, %v545_v6  ;;  %v617_v2 = vld [vmem:[#allocation2 + $0xfe0] sm:$0xff]  ;;  %v618_v3 = vld [vmem:[#allocation2 + $0xfe8] sm:$0xff] }
  0xd4   :  { %1207 = vmatpush.bf16.msra.mxu1 %v827_v18  ;;  %v969_v4 = vadd.f32 %v968_v0, %v956_v57  ;;  %v981_v5 = vpop.f32.mrf.mxu3  ;;  %v957_v16 = vpop.f32.mrf.mxu1  ;;  %v512_v18 = vld [vmem:[#allocation2 + $0xc98] sm:$0xff]  ;;  %v569_v57 = vld [vmem:[#allocation2 + $0xe60] sm:$0xff]  ;;  %v602_v0 = vld [vmem:[#allocation2 + $0xf68] sm:$0xff] }
  0xd5   :  { %1220 = vmatpush.bf16.msra.mxu2 %v835_v19  ;;  %v527_v19 = vld [vmem:[#allocation2 + $0xd10] sm:$0xff]  ;;  %v822_v26 = vpack.c.bf16 %v512_v18, %v511_v15  ;;  %v867_v7 = vpack.c.bf16 %v602_v0, %v601_v63  ;;  %v568_v10 = vld [vmem:[#allocation2 + $0xe58] sm:$0xff] }
  0xd6   :  { %1233 = vmatpush.bf16.msra.mxu3 %v843_v23  ;;  %v1506_v9 = vadd.f32 %v981_v5, %v969_v4  ;;  %v814_v23 = vpack.c.bf16 %v496_v14, %v495_v13  ;;  %v830_v27 = vpack.c.bf16 %v528_v20, %v527_v19  ;;  %v104_v4 = vpack.c.bf16 %v72_v54, %v72_v54  ;;  %v584_v13 = vld [vmem:[#allocation2 + $0xed8] sm:$0xff]  ;;  %v599_v14 = vld [vmem:[#allocation2 + $0xf50] sm:$0xff]  ;;  %v578_v54 = vld [vmem:[#allocation2 + $0xea8] sm:$0xff] }
  0xd7   :  { %1195 = vmatpush.bf16.msra.mxu0 %v818_v29  ;;  %v510_v29 = vld [vmem:[#allocation2 + $0xc88] sm:$0xff]  ;;  %v600_v15 = vld [vmem:[#allocation2 + $0xf58] sm:$0xff]  ;;  %v615_v16 = vld [vmem:[#allocation2 + $0xfd0] sm:$0xff] }
  0xd8   :  { %1208 = vmatpush.bf16.msra.mxu1 %v826_v30  ;;  %v525_v30 = vld [vmem:[#allocation2 + $0xd00] sm:$0xff]  ;;  %v866_v20 = vpack.c.bf16 %v600_v15, %v599_v14 }
  0xd9   :  { %1221 = vmatpush.bf16.msra.mxu2 %v834_v31  ;;  %v829_v46 = vpack.c.bf16 %v526_v33, %v525_v30  ;;  %v614_v30 = vld [vmem:[#allocation2 + $0xfc8] sm:$0xff]  ;;  %v557_v15 = vld [vmem:[#allocation2 + $0xe00] sm:$0xff] }
  0xda   :  { %1234 = vmatpush.bf16.msra.mxu3 %v842_v36  ;;  %v542_v36 = vld [vmem:[#allocation2 + $0xd88] sm:$0xff] }
  0xdb   :  { %1196 = vmatpush.bf16.msra.mxu0 %v817_v42  ;;  %v970_v31 = vpop.f32.mrf.mxu2  ;;  %v588_v42 = vld [vmem:[#allocation2 + $0xef8] sm:$0xff]  ;;  %v837_v50 = vpack.c.bf16 %v542_v36, %v541_v34 }
  0xdc   :  { %1209 = vmatpush.bf16.msra.mxu1 %v825_v44  ;;  %v983_v37 = vpop.f32.mrf.mxu3  ;;  %v604_v44 = vld [vmem:[#allocation2 + $0xf78] sm:$0xff]  ;;  %v860_v55 = vpack.c.bf16 %v588_v42, %v587_v40 }
  0xdd   :  { %1222 = vmatpush.bf16.msra.mxu2 %v833_v45  ;;  %v821_v45 = vpack.c.bf16 %v510_v29, %v509_v28  ;;  %v868_v56 = vpack.c.bf16 %v604_v44, %v603_v43  ;;  %v613_v29 = vld [vmem:[#allocation2 + $0xfc0] sm:$0xff]  ;;  %v563_v37 = vld [vmem:[#allocation2 + $0xe30] sm:$0xff]  ;;  %v580_v42 = vld [vmem:[#allocation2 + $0xeb8] sm:$0xff] }
  0xde   :  { %1235 = vmatpush.bf16.msra.mxu3 %v841_v51  ;;  %v852_v51 = vpack.c.bf16 %v572_v39, %v571_v38  ;;  %v564_v38 = vld [vmem:[#allocation2 + $0xe38] sm:$0xff]  ;;  %v579_v39 = vld [vmem:[#allocation2 + $0xeb0] sm:$0xff]  ;;  %v873_v40 = vpack.c.bf16 %v614_v30, %v613_v29  ;;  %v74_v30 = vld [vmem:[%s1536_s0 + $0xe8] sm:$0xff] }
  0xdf   :  { %1197 = vmatpush.bf16.msra.mxu0 %v816_v58  ;;  %v570_v58 = vld [vmem:[#allocation2 + $0xe68] sm:$0xff]  ;;  %v595_v43 = vld [vmem:[#allocation2 + $0xf30] sm:$0xff]  ;;  %v596_v44 = vld [vmem:[#allocation2 + $0xf38] sm:$0xff] }
  0xe0   :  { %1210 = vmatpush.bf16.msra.mxu1 %v824_v59  ;;  %v585_v59 = vld [vmem:[#allocation2 + $0xee0] sm:$0xff]  ;;  %v851_v5 = vpack.c.bf16 %v570_v58, %v569_v57 }
  0xe1   :  { %1223 = vmatpush.bf16.msra.mxu2 %v832_v60  ;;  %v876_v60 = vpack.c.bf16 %v620_v48, %v619_v47  ;;  %v859_v6 = vpack.c.bf16 %v586_v62, %v585_v59  ;;  %v848_v47 = vpack.c.bf16 %v564_v38, %v563_v37  ;;  %v864_v48 = vpack.c.bf16 %v596_v44, %v595_v43  ;;  %v609_v59 = vld [vmem:[#allocation2 + $0xfa0] sm:$0xff] }
  0xe2   :  { %1236 = vmatpush.bf16.msra.mxu3 %v840_v35  ;;  %v103_v35 = vpack.c.bf16 %v71_v52, %v71_v52 }
  0xe3   :  { %1198 = vmatpush.bf16.msra.mxu0 %v815_v8  ;;  %v567_v8 = vld [vmem:[#allocation2 + $0xe50] sm:$0xff] }
  0xe4   :  { %1211 = vmatpush.bf16.msra.mxu1 %v823_v11  ;;  %v583_v11 = vld [vmem:[#allocation2 + $0xed0] sm:$0xff]  ;;  %v850_v18 = vpack.c.bf16 %v568_v10, %v567_v8  ;;  %v592_v8 = vld [vmem:[#allocation2 + $0xf18] sm:$0xff] }
  0xe5   :  { %1224 = vmatpush.bf16.msra.mxu2 %v831_v12  ;;  %v875_v12 = vpack.c.bf16 %v618_v3, %v617_v2  ;;  %v858_v19 = vpack.c.bf16 %v584_v13, %v583_v11  ;;  %v559_v2 = vld [vmem:[#allocation2 + $0xe10] sm:$0xff]  ;;  %v560_v3 = vld [vmem:[#allocation2 + $0xe18] sm:$0xff] }
  0xe6   :  { %1237 = vmatpush.bf16.msra.mxu3 %v839_v17  ;;  %v616_v17 = vld [vmem:[#allocation2 + $0xfd8] sm:$0xff]  ;;  %v607_v10 = vld [vmem:[#allocation2 + $0xf90] sm:$0xff] }
  0xe7   :  { %1199 = vmatpush.bf16.msra.mxu0 %v814_v23  ;;  %v581_v23 = vld [vmem:[#allocation2 + $0xec0] sm:$0xff]  ;;  %v874_v24 = vpack.c.bf16 %v616_v17, %v615_v16  ;;  %v608_v11 = vld [vmem:[#allocation2 + $0xf98] sm:$0xff]  ;;  %v558_v16 = vld [vmem:[#allocation2 + $0xe08] sm:$0xff] }
  0xe8   :  { %1212 = vmatpush.bf16.msra.mxu1 %v822_v26  ;;  %v597_v26 = vld [vmem:[#allocation2 + $0xf40] sm:$0xff]  ;;  %v857_v34 = vpack.c.bf16 %v582_v25, %v581_v23 }
  0xe9   :  { %1225 = vmatpush.bf16.msra.mxu2 %v830_v27  ;;  %v598_v27 = vld [vmem:[#allocation2 + $0xf48] sm:$0xff]  ;;  %v573_v17 = vld [vmem:[#allocation2 + $0xe80] sm:$0xff] }
  0xea   :  { %1238 = vmatpush.bf16.msra.mxu3 %v838_v32  ;;  %v849_v32 = vpack.c.bf16 %v566_v22, %v565_v21  ;;  %v865_v36 = vpack.c.bf16 %v598_v27, %v597_v26  ;;  %v590_v21 = vld [vmem:[#allocation2 + $0xf08] sm:$0xff]  ;;  %v605_v23 = vld [vmem:[#allocation2 + $0xf80] sm:$0xff]  ;;  %v845_v26 = vpack.c.bf16 %v558_v16, %v557_v15 }
  0xeb   :  { %1200 = vmatpush.bf16.msra.mxu0 %v813_v41  ;;  %v994_v28 = vpop.f32.mrf.mxu0  ;;  %v73_v27 = vld [vmem:[%s1536_s0 + $0xe0] sm:$0xff] }
  0xec   :  { %1213 = vmatpush.bf16.msra.mxu1 %v821_v45  ;;  %v995_v31 = vadd.f32 %v994_v28, %v1506_v9  ;;  %v1007_v33 = vpop.f32.mrf.mxu1  ;;  %v611_v45 = vld [vmem:[#allocation2 + $0xfb0] sm:$0xff]  ;;  %v856_v9 = vpack.c.bf16 %v580_v42, %v579_v39 }
  0xed   :  { %1226 = vmatpush.bf16.msra.mxu2 %v829_v46  ;;  %v612_v46 = vld [vmem:[#allocation2 + $0xfb8] sm:$0xff] }
  0xee   :  { %1239 = vmatpush.bf16.msra.mxu3 %v837_v50  ;;  %1201 = vmatmul.bf16.vlgmr.msra.gmra.mxu0 %v101_v61  ;;  %v1008_v41 = vadd.f32 %v1007_v33, %v995_v31  ;;  %v562_v50 = vld [vmem:[#allocation2 + $0xe28] sm:$0xff]  ;;  %v872_v52 = vpack.c.bf16 %v612_v46, %v611_v45  ;;  %v75_v31 = vld [vmem:[%s1536_s0 + $0xf0] sm:$0xff]  ;;  %v76_v33 = vld [vmem:[%s1536_s0 + $0xf8] sm:$0xff]  ;;  %s1404_s0 = smov [#allocation7]  }
  0xef   :  { %1245 = vmatpush.bf16.msrb.mxu0 %v852_v51  ;;  %1214 = vmatmul.bf16.vlgmr.msra.gmra.mxu1 %v102_v1  ;;  %v577_v51 = vld [vmem:[#allocation2 + $0xea0] sm:$0xff]  ;;  %v847_v62 = vpack.c.bf16 %v562_v50, %v561_v49  ;;  %v107_v37 = vpack.c.bf16 %v75_v31, %v75_v31  ;;  %v108_v38 = vpack.c.bf16 %v76_v33, %v76_v33  ;;  %s1303_s28 = sshll.u32 %s1404_s0, 4  ;;  %s1304_s28 = int_to_ptr.vmem [resolvable:$true] %s1303_s28 }
  0xf0   :  { %1258 = vmatpush.bf16.msrb.mxu1 %v860_v55  ;;  %1227 = vmatmul.bf16.vlgmr.msra.gmra.mxu2 %v103_v35  ;;  %v593_v55 = vld [vmem:[#allocation2 + $0xf20] sm:$0xff]  ;;  %v855_v35 = vpack.c.bf16 %v578_v54, %v577_v51 }
  0xf1   :  { %1271 = vmatpush.bf16.msrb.mxu2 %v868_v56  ;;  %1240 = vmatmul.bf16.vlgmr.msra.gmra.mxu3 %v104_v4  ;;  %v594_v56 = vld [vmem:[#allocation2 + $0xf28] sm:$0xff]  ;;  %v575_v4 = vld [vmem:[#allocation2 + $0xe90] sm:$0xff] }
  0xf2   :  { %1284 = vmatpush.bf16.msrb.mxu3 %v876_v60  ;;  %v610_v60 = vld [vmem:[#allocation2 + $0xfa8] sm:$0xff]  ;;  %v863_v1 = vpack.c.bf16 %v594_v56, %v593_v55 }
  0xf3   :  { %1246 = vmatpush.bf16.msrb.mxu0 %v851_v5  ;;  %v1020_v53 = vpop.f32.mrf.mxu2  ;;  %v996_v61 = vpop.f32.mrf.mxu0  ;;  %v871_v5 = vpack.c.bf16 %v610_v60, %v609_v59 }
  0xf4   :  { %1259 = vmatpush.bf16.msrb.mxu1 %v859_v6  ;;  %v1021_v57 = vadd.f32 %v1020_v53, %v1008_v41  ;;  %v1033_v58 = vpop.f32.mrf.mxu3  ;;  %v1009_v63 = vpop.f32.mrf.mxu1  ;;  %v576_v6 = vld [vmem:[#allocation2 + $0xe98] sm:$0xff] }
  0xf5   :  { %1272 = vmatpush.bf16.msrb.mxu2 %v867_v7  ;;  %v591_v7 = vld [vmem:[#allocation2 + $0xf10] sm:$0xff]  ;;  %v854_v13 = vpack.c.bf16 %v576_v6, %v575_v4 }
  0xf6   :  { %1285 = vmatpush.bf16.msrb.mxu3 %v875_v12  ;;  %v1034_v0 = vadd.f32 %v1033_v58, %v1021_v57  ;;  %v846_v12 = vpack.c.bf16 %v560_v3, %v559_v2  ;;  %v862_v14 = vpack.c.bf16 %v592_v8, %v591_v7 }
  0xf7   :  { %1247 = vmatpush.bf16.msrb.mxu0 %v850_v18  ;;  %v870_v18 = vpack.c.bf16 %v608_v11, %v607_v10 }
  0xf8   :  { %1260 = vmatpush.bf16.msrb.mxu1 %v858_v19  ;;  %v574_v19 = vld [vmem:[#allocation2 + $0xe88] sm:$0xff] }
  0xf9   :  { %1273 = vmatpush.bf16.msrb.mxu2 %v866_v20  ;;  %v589_v20 = vld [vmem:[#allocation2 + $0xf00] sm:$0xff]  ;;  %v853_v28 = vpack.c.bf16 %v574_v19, %v573_v17 }
  0xfa   :  { %1286 = vmatpush.bf16.msrb.mxu3 %v874_v24  ;;  %v606_v24 = vld [vmem:[#allocation2 + $0xf88] sm:$0xff]  ;;  %v861_v29 = vpack.c.bf16 %v590_v21, %v589_v20 }
  0xfb   :  { %1248 = vmatpush.bf16.msrb.mxu0 %v849_v32  ;;  %v1022_v22 = vpop.f32.mrf.mxu2  ;;  %v869_v32 = vpack.c.bf16 %v606_v24, %v605_v23 }
  0xfc   :  { %1261 = vmatpush.bf16.msrb.mxu1 %v857_v34  ;;  %v1035_v25 = vpop.f32.mrf.mxu3  ;;  %v105_v34 = vpack.c.bf16 %v73_v27, %v73_v27 }
  0xfd   :  { %1274 = vmatpush.bf16.msrb.mxu2 %v865_v36  ;;  %v106_v36 = vpack.c.bf16 %v74_v30, %v74_v30 }
  0xfe   :  { %1287 = vmatpush.bf16.msrb.mxu3 %v873_v40 }
  0xff   :  { %1249 = vmatpush.bf16.msrb.mxu0 %v848_v47 }
 0x100   :  { %1262 = vmatpush.bf16.msrb.mxu1 %v856_v9 }
 0x101   :  { %1275 = vmatpush.bf16.msrb.mxu2 %v864_v48 }
 0x102   :  { %1288 = vmatpush.bf16.msrb.mxu3 %v872_v52 }
 0x103   :  { %1250 = vmatpush.bf16.msrb.mxu0 %v847_v62 }
 0x104   :  { %1263 = vmatpush.bf16.msrb.mxu1 %v855_v35 }
 0x105   :  { %1276 = vmatpush.bf16.msrb.mxu2 %v863_v1 }
 0x106   :  { %1289 = vmatpush.bf16.msrb.mxu3 %v871_v5 }
 0x107   :  { %1251 = vmatpush.bf16.msrb.mxu0 %v846_v12 }
 0x108   :  { %1264 = vmatpush.bf16.msrb.mxu1 %v854_v13 }
 0x109   :  { %1277 = vmatpush.bf16.msrb.mxu2 %v862_v14 }
 0x10a   :  { %1290 = vmatpush.bf16.msrb.mxu3 %v870_v18 }
 0x10b   :  { %1252 = vmatpush.bf16.msrb.mxu0 %v845_v26  ;;  %v1046_v39 = vpop.f32.mrf.mxu0 }
 0x10c   :  { %1265 = vmatpush.bf16.msrb.mxu1 %v853_v28  ;;  %v1047_v40 = vadd.f32 %v1046_v39, %v1034_v0  ;;  %v1059_v41 = vpop.f32.mrf.mxu1 }
 0x10d   :  { %1278 = vmatpush.bf16.msrb.mxu2 %v861_v29 }
 0x10e   :  { %1291 = vmatpush.bf16.msrb.mxu3 %v869_v32  ;;  %1253 = vmatmul.bf16.vlgmr.msrb.gmra.mxu0 %v105_v34  ;;  %v1060_v42 = vadd.f32 %v1059_v41, %v1047_v40 }
 0x10f   :  { %1266 = vmatmul.bf16.vlgmr.msrb.gmra.mxu1 %v106_v36 }
 0x110   :  { %1279 = vmatmul.bf16.vlgmr.msrb.gmra.mxu2 %v107_v37 }
 0x111   :  { %1292 = vmatmul.bf16.vlgmr.msrb.gmra.mxu3 %v108_v38 }
 0x113   :  { %v1072_v43 = vpop.f32.mrf.mxu2  ;;  %v1048_v46 = vpop.f32.mrf.mxu0 }
 0x114   :  { %v1073_v44 = vadd.f32 %v1072_v43, %v1060_v42  ;;  %v1085_v45 = vpop.f32.mrf.mxu3  ;;  %v1061_v47 = vpop.f32.mrf.mxu1 }
 0x116   :  { %v1086_v9 = vadd.f32 %v1085_v45, %v1073_v44 }
 0x11b   :  { %v1074_v48 = vpop.f32.mrf.mxu2 }
 0x11c   :  { %v1087_v49 = vpop.f32.mrf.mxu3 }
 0x12b   :  { %v1098_v50 = vpop.f32.mrf.mxu0 }
 0x12c   :  { %v1099_v51 = vadd.f32 %v1098_v50, %v1086_v9  ;;  %v1111_v52 = vpop.f32.mrf.mxu1 }
 0x12e   :  { %v1112_v53 = vadd.f32 %v1111_v52, %v1099_v51 }
 0x133   :  { %v1124_v54 = vpop.f32.mrf.mxu2  ;;  %v1100_v57 = vpop.f32.mrf.mxu0 }
 0x134   :  { %v1125_v55 = vadd.f32 %v1124_v54, %v1112_v53  ;;  %v1137_v56 = vpop.f32.mrf.mxu3  ;;  %v1113_v58 = vpop.f32.mrf.mxu1 }
 0x136   :  { %v1138_v59 = vadd.f32 %v1137_v56, %v1125_v55 }
 0x13b   :  { %v1126_v60 = vpop.f32.mrf.mxu2 }
 0x13c   :  { %v1139_v61 = vpop.f32.mrf.mxu3 }
 0x14b   :  { %v1150_v62 = vpop.f32.mrf.mxu0 }
 0x14c   :  { %v1163_v63 = vpop.f32.mrf.mxu1  ;;  %v1151_v7 = vadd.f32 %v1150_v62, %v1138_v59 }
 0x14e   :  { %v1164_v13 = vadd.f32 %v1163_v63, %v1151_v7 }
 0x153   :  { %v1176_v0 = vpop.f32.mrf.mxu2  ;;  %v1152_v1 = vpop.f32.mrf.mxu0 }
 0x154   :  { %v1189_v35 = vpop.f32.mrf.mxu3  ;;  %v1165_v2 = vpop.f32.mrf.mxu1  ;;  %v1177_v14 = vadd.f32 %v1176_v0, %v1164_v13 }
 0x156   :  { %v1190_v17 = vadd.f32 %v1189_v35, %v1177_v14 }
 0x15b   :  { %v1178_v3 = vpop.f32.mrf.mxu2 }
 0x15c   :  { %v1191_v4 = vpop.f32.mrf.mxu3 }
 0x16b   :  { %v1202_v5 = vpop.f32.mrf.mxu0 }
 0x16c   :  { %v1215_v6 = vpop.f32.mrf.mxu1  ;;  %v1203_v18 = vadd.f32 %v1202_v5, %v1190_v17 }
 0x16e   :  { %v1216_v19 = vadd.f32 %v1215_v6, %v1203_v18 }
 0x173   :  { %v1228_v8 = vpop.f32.mrf.mxu2  ;;  %v1204_v11 = vpop.f32.mrf.mxu0 }
 0x174   :  { %v1241_v10 = vpop.f32.mrf.mxu3  ;;  %v1217_v12 = vpop.f32.mrf.mxu1  ;;  %v1229_v20 = vadd.f32 %v1228_v8, %v1216_v19 }
 0x176   :  { %v1242_v21 = vadd.f32 %v1241_v10, %v1229_v20 }
 0x17b   :  { %v1230_v15 = vpop.f32.mrf.mxu2 }
 0x17c   :  { %v1243_v16 = vpop.f32.mrf.mxu3 }
 0x18b   :  { %v1254_v22 = vpop.f32.mrf.mxu0 }
 0x18c   :  { %v1267_v23 = vpop.f32.mrf.mxu1  ;;  %v1255_v24 = vadd.f32 %v1254_v22, %v1242_v21 }
 0x18e   :  { %v1268_v25 = vadd.f32 %v1267_v23, %v1255_v24 }
 0x193   :  { %v1280_v26 = vpop.f32.mrf.mxu2  ;;  %v1256_v29 = vpop.f32.mrf.mxu0 }
 0x194   :  { %v1281_v27 = vadd.f32 %v1280_v26, %v1268_v25  ;;  %v1293_v28 = vpop.f32.mrf.mxu3  ;;  %v1269_v30 = vpop.f32.mrf.mxu1 }
 0x196   :  { %v1294_v31 = vadd.f32 %v1293_v28, %v1281_v27 }
 0x198   :  { %1297 = vst [vmem:[#allocation7] sm:$0xff] %v1294_v31 }
 0x199   :  { %1308 = dma.vmem_to_hbm [thread:$0]  %s1304_s28, 128, %s1306_s4, [#allocation4]  }
 0x19b   :  { %v1282_v32 = vpop.f32.mrf.mxu2 }
 0x19c   :  { %v1295_v33 = vpop.f32.mrf.mxu3 }
 0x19d   :  { %1398 = dma.done.wait [#allocation4], 128  }
 0x19e   :  { %1399 = vsyncadd [#allocation4], 4294967168 }
 0x19f   :  { %1313 = vsyncpa [#allocation3], 1 }
 0x1a0   :  { %1314 = vsyncpa [#allocation6], 1 }
 0x1a1   :  { %1315 = vsyncpa [#allocation4], 1 }

</bundles_post_ra>
